<compile_context>
chip_gen: v7x
topology: tpu7x:2x2x1
jax: 0.10.0
libtpu: 0.0.40
codegen_flags: <defaults>
</compile_context>

<pallas_src>
import functools

import jax
import jax.numpy as jnp
from jax import lax
from jax.experimental import pallas as pl
from jax.experimental.pallas import tpu as pltpu


# ----------------------------------------------------------------------------
# kernel 1: per-(batch, row-tile, head) fused QKV projection (weights resident)
# ----------------------------------------------------------------------------
def _qkv_proj_kernel(x_ref, w_ref, b_ref, q_ref, k_ref, v_ref, *, dq, dv):
    h = pl.program_id(2)
    x = x_ref[0]                                                     # (tq, C) bf16
    w = w_ref[h]                                                     # (C, 2dq+dv) bf16
    y = jnp.dot(x, w, preferred_element_type=jnp.float32) + b_ref[h]  # (tq, 2dq+dv) f32
    q_ref[0, 0] = y[:, :dq].astype(jnp.bfloat16)
    k_ref[0, 0] = y[:, dq:2 * dq].astype(jnp.bfloat16)
    v_ref[0, 0] = y[:, 2 * dq:].astype(jnp.bfloat16)


# ----------------------------------------------------------------------------
# kernel 2: per-(batch, head, row-tile) attention; K/V resident across row tiles
# ----------------------------------------------------------------------------
def _attention_kernel(q_ref, k_ref, v_ref, kmask_ref, ctx_ref, *, masked):
    q = q_ref[0, 0]                                                  # (tq, dq) bf16 (scale folded)
    k = k_ref[0, 0]                                                  # (Np, dq) bf16
    v = v_ref[0, 0]                                                  # (Np, dv) bf16

    # lane-dense (tq, Np) scores, bf16 operands, f32 MXU accumulation
    s = lax.dot_general(q, k, (((1,), (1,)), ((), ())),
                        preferred_element_type=jnp.float32)          # (tq, Np)
    if masked:
        s = s + kmask_ref[...]                                       # -1e30 on padded key cols

    m = jnp.max(s, axis=-1, keepdims=True)
    e = jnp.exp(s - m)                                               # f32
    denom = jnp.sum(e, axis=-1, keepdims=True)

    # deferred normalization: scale the (tq, dv) context, not the (tq, Np) probs
    ctx = jnp.dot(e.astype(jnp.bfloat16), v,
                  preferred_element_type=jnp.float32)                # (tq, dv)
    ctx = ctx * pl.reciprocal(denom, approx=True)
    ctx_ref[0, 0] = ctx.astype(jnp.bfloat16)


# ----------------------------------------------------------------------------
# kernel 3: per-(batch, row-tile) output projection (full-depth matmul)
# ----------------------------------------------------------------------------
def _proj_kernel(x_ref, w_ref, b_ref, o_ref):
    o_ref[0] = (jnp.dot(x_ref[0], w_ref[...], preferred_element_type=jnp.float32)
                + b_ref[...])


# ----------------------------------------------------------------------------
# wrapper
# ----------------------------------------------------------------------------
def attention_forward(x, H, W, params, *, num_heads, sr_ratio=1, qk_scale=None):
    """Pallas forward of Attention.forward(x, H, W). x: (B, N, C) float32."""
    if sr_ratio != 1:
        raise NotImplementedError("sr_ratio > 1 is not supported")

    B, N, C = x.shape
    assert N == H * W
    Dq = params["wq"].shape[1]
    nh = num_heads
    dq = Dq // nh
    dv = C // nh
    scale = float(qk_scale) if qk_scale is not None else float((C // nh) ** -0.5)

    # pad N to a multiple of 128; cap the row tile at 256 (v7x 64 MiB VMEM budget)
    n_pad = ((N + 127) // 128) * 128
    tq = 256 if n_pad % 256 == 0 else 128
    nt = n_pad // tq
    masked = n_pad != N

    f32, bf16 = jnp.float32, jnp.bfloat16
    dsum = 2 * dq + dv

    xb = x.astype(bf16)
    if masked:
        xb = jnp.pad(xb, ((0, 0), (0, n_pad - N), (0, 0)))

    # fold the softmax scale into the query projection (weight + bias)
    wq = params["wq"] * scale
    bq = params["bq"] * scale

    # per-head fused QKV weight/bias, head-major, bf16 MXU operands (VMEM-resident)
    wq_h = wq.reshape(C, nh, dq).transpose(1, 0, 2)
    wk_h = params["wk"].reshape(C, nh, dq).transpose(1, 0, 2)
    wv_h = params["wv"].reshape(C, nh, dv).transpose(1, 0, 2)
    w_qkv = jnp.concatenate([wq_h, wk_h, wv_h], axis=-1).astype(bf16)    # (nh, C, 2dq+dv)
    b_qkv = jnp.concatenate([
        bq.reshape(nh, 1, dq),
        params["bk"].reshape(nh, 1, dq),
        params["bv"].reshape(nh, 1, dv)], axis=-1).astype(f32)           # (nh, 1, 2dq+dv)

    wp = params["wp"].astype(bf16)                                       # (C, C)
    bp = params["bp"].reshape(1, C).astype(f32)

    # additive key mask for padded columns (0 valid / -1e30 padded)
    col = jnp.arange(n_pad)
    kmask = jnp.where(col < N, 0.0, -1e30).astype(f32).reshape(1, n_pad)

    # explicit scoped-VMEM budget with headroom (scores temporaries + resident K/V)
    est = (4 * tq * n_pad * 4              # softmax temporaries (f32)
           + 4 * n_pad * (dq + dv) * 2     # double-buffered K/V (bf16)
           + 4 * tq * (dq + dv + C) * 2    # q / ctx tiles
           + (4 << 20))                    # headroom
    vmem_limit = int(min(max(est, 32 << 20), 64 << 20))

    # ---- kernel 1: QKV projection --------------------------------------------------
    q, k, v = pl.pallas_call(
        functools.partial(_qkv_proj_kernel, dq=dq, dv=dv),
        out_shape=(
            jax.ShapeDtypeStruct((B, nh, n_pad, dq), bf16),
            jax.ShapeDtypeStruct((B, nh, n_pad, dq), bf16),
            jax.ShapeDtypeStruct((B, nh, n_pad, dv), bf16),
        ),
        grid=(B, nt, nh),
        in_specs=[
            pl.BlockSpec((1, tq, C), lambda b, t, h: (b, t, 0)),
            pl.BlockSpec((nh, C, dsum), lambda b, t, h: (0, 0, 0)),   # resident
            pl.BlockSpec((nh, 1, dsum), lambda b, t, h: (0, 0, 0)),   # resident
        ],
        out_specs=(
            pl.BlockSpec((1, 1, tq, dq), lambda b, t, h: (b, h, t, 0)),
            pl.BlockSpec((1, 1, tq, dq), lambda b, t, h: (b, h, t, 0)),
            pl.BlockSpec((1, 1, tq, dv), lambda b, t, h: (b, h, t, 0)),
        ),
        compiler_params=pltpu.CompilerParams(
            dimension_semantics=("parallel", "parallel", "parallel")),
    )(xb, w_qkv, b_qkv)

    # ---- kernel 2: attention (K/V fetched once per (b, h)) -------------------------
    ctx = pl.pallas_call(
        functools.partial(_attention_kernel, masked=masked),
        out_shape=jax.ShapeDtypeStruct((B, nh, n_pad, dv), bf16),
        grid=(B, nh, nt),
        in_specs=[
            pl.BlockSpec((1, 1, tq, dq), lambda b, h, t: (b, h, t, 0)),
            pl.BlockSpec((1, 1, n_pad, dq), lambda b, h, t: (b, h, 0, 0)),  # resident over t
            pl.BlockSpec((1, 1, n_pad, dv), lambda b, h, t: (b, h, 0, 0)),  # resident over t
            pl.BlockSpec((1, n_pad), lambda b, h, t: (0, 0)),               # resident
        ],
        out_specs=pl.BlockSpec((1, 1, tq, dv), lambda b, h, t: (b, h, t, 0)),
        compiler_params=pltpu.CompilerParams(
            dimension_semantics=("parallel", "parallel", "arbitrary"),
            vmem_limit_bytes=vmem_limit),
    )(q, k, v, kmask)

    # wrapper-side layout plumbing: head-major ctx -> (B, N_pad, C)
    ctx_bnc = jnp.transpose(ctx, (0, 2, 1, 3)).reshape(B, n_pad, C)

    # ---- kernel 3: output projection ------------------------------------------------
    out = pl.pallas_call(
        _proj_kernel,
        out_shape=jax.ShapeDtypeStruct((B, n_pad, C), f32),
        grid=(B, nt),
        in_specs=[
            pl.BlockSpec((1, tq, C), lambda b, t: (b, t, 0)),
            pl.BlockSpec((C, C), lambda b, t: (0, 0)),    # resident
            pl.BlockSpec((1, C), lambda b, t: (0, 0)),    # resident
        ],
        out_specs=pl.BlockSpec((1, tq, C), lambda b, t: (b, t, 0)),
        compiler_params=pltpu.CompilerParams(
            dimension_semantics=("parallel", "parallel")),
    )(ctx_bnc, wp, bp)

    return out[:, :N, :] if masked else out


# ----------------------------------------------------------------------------
# plain-JAX reference (mirrors the PyTorch forward, sr_ratio == 1)
# ----------------------------------------------------------------------------
def attention_reference(x, params, *, num_heads, qk_scale=None):
    B, N, C = x.shape
    Dq = params["wq"].shape[1]
    dq = Dq // num_heads
    dv = C // num_heads
    scale = qk_scale if qk_scale is not None else (C // num_heads) ** -0.5
    q = x @ params["wq"] + params["bq"]
    k = x @ params["wk"] + params["bk"]
    v = x @ params["wv"] + params["bv"]
    q = q.reshape(B, N, num_heads, dq).transpose(0, 2, 1, 3)
    k = k.reshape(B, N, num_heads, dq).transpose(0, 2, 1, 3)
    v = v.reshape(B, N, num_heads, dv).transpose(0, 2, 1, 3)
    s = jnp.einsum("bhqd,bhkd->bhqk", q, k) * scale
    p = jax.nn.softmax(s, axis=-1)
    ctx = jnp.einsum("bhqk,bhkd->bhqd", p, v)
    y = ctx.transpose(0, 2, 1, 3).reshape(B, N, C)
    return y @ params["wp"] + params["bp"]


def init_params(key, *, hidden_size, qk_ratio=1, qkv_bias=False):
    C = hidden_size
    Dq = C // qk_ratio
    ks = jax.random.split(key, 8)

    def nrm(k, shape, scale=0.1):
        return (scale * jax.random.normal(k, shape)).astype(jnp.float32)

    return {
        "wq": nrm(ks[0], (C, Dq)),     # torch query.weight.T
        "wk": nrm(ks[1], (C, Dq)),     # torch key.weight.T
        "wv": nrm(ks[2], (C, C)),      # torch value.weight.T
        "wp": nrm(ks[3], (C, C)),      # torch proj.weight.T
        "bq": nrm(ks[4], (Dq,)) if qkv_bias else jnp.zeros((Dq,), jnp.float32),
        "bk": nrm(ks[5], (Dq,)) if qkv_bias else jnp.zeros((Dq,), jnp.float32),
        "bv": nrm(ks[6], (C,)) if qkv_bias else jnp.zeros((C,), jnp.float32),
        "bp": nrm(ks[7], (C,)),
    }


if __name__ == "__main__":
    # H = W = 14 -> N = 196 (not a multiple of 128): exercises the padding + key-mask path.
    B, HIDDEN, NUM_HEADS, H, W = 2, 32, 4, 14, 14
    N = H * W
    kp, kx = jax.random.split(jax.random.PRNGKey(0))
    params = init_params(kp, hidden_size=HIDDEN, qkv_bias=True)
    x = jax.random.normal(kx, (B, N, HIDDEN), dtype=jnp.float32)

    fwd = jax.jit(lambda xx: attention_forward(xx, H, W, params, num_heads=NUM_HEADS))
    out = jax.block_until_ready(fwd(x))

    assert out.shape == (B, N, HIDDEN), out.shape
    assert bool(jnp.all(jnp.isfinite(out)))
    ref = attention_reference(x, params, num_heads=NUM_HEADS)
    err = float(jnp.max(jnp.abs(out - ref)))
    assert err < 5e-2, err
    print("KERNEL_OK")
</pallas_src>

<mosaic_0001>
module attributes {stable_mosaic.version = 11 : i64} {
  func.func @_attention_kernel(%arg0: i32, %arg1: i32, %arg2: i32, %arg3: memref<1x1x256x8xbf16, #tpu.memory_space<vmem>>, %arg4: memref<1x1x256x8xbf16, #tpu.memory_space<vmem>>, %arg5: memref<1x1x256x8xbf16, #tpu.memory_space<vmem>>, %arg6: memref<1x256xf32, #tpu.memory_space<vmem>>, %arg7: memref<1x1x256x8xbf16, #tpu.memory_space<vmem>>) attributes {dimension_semantics = [#tpu.dimension_semantics<parallel>, #tpu.dimension_semantics<parallel>, #tpu.dimension_semantics<arbitrary>], iteration_bounds = array<i64: 2, 4, 1>, scalar_prefetch = 0 : i64, scratch_operands = 0 : i64, tpu.core_type = #tpu.core_type<tc>, window_params = [{transform_indices = @transform_0, window_bounds = array<i64: 1, 1, 256, 8>}, {transform_indices = @transform_1, window_bounds = array<i64: 1, 1, 256, 8>}, {transform_indices = @transform_2, window_bounds = array<i64: 1, 1, 256, 8>}, {pipeline_mode = #tpu.pipeline_mode<synchronous>, transform_indices = @transform_3, window_bounds = array<i64: 1, 256>}, {transform_indices = @transform_4, window_bounds = array<i64: 1, 1, 256, 8>}]} {
    %c0 = arith.constant 0 : index
    %c0_0 = arith.constant 0 : index
    %c0_1 = arith.constant 0 : index
    %c0_2 = arith.constant 0 : index
    %0 = vector.load %arg3[%c0, %c0_0, %c0_1, %c0_2] : memref<1x1x256x8xbf16, #tpu.memory_space<vmem>>, vector<1x1x256x8xbf16>
    %1 = vector.shape_cast %0 : vector<1x1x256x8xbf16> to vector<256x8xbf16>
    %c0_3 = arith.constant 0 : index
    %c0_4 = arith.constant 0 : index
    %c0_5 = arith.constant 0 : index
    %c0_6 = arith.constant 0 : index
    %2 = vector.load %arg4[%c0_3, %c0_4, %c0_5, %c0_6] : memref<1x1x256x8xbf16, #tpu.memory_space<vmem>>, vector<1x1x256x8xbf16>
    %3 = vector.shape_cast %2 : vector<1x1x256x8xbf16> to vector<256x8xbf16>
    %c0_7 = arith.constant 0 : index
    %c0_8 = arith.constant 0 : index
    %c0_9 = arith.constant 0 : index
    %c0_10 = arith.constant 0 : index
    %4 = vector.load %arg5[%c0_7, %c0_8, %c0_9, %c0_10] : memref<1x1x256x8xbf16, #tpu.memory_space<vmem>>, vector<1x1x256x8xbf16>
    %5 = vector.shape_cast %4 : vector<1x1x256x8xbf16> to vector<256x8xbf16>
    %cst = arith.constant dense<0.000000e+00> : vector<256x256xf32>
    %6 = tpu.matmul %1, %3, %cst {dimension_numbers = #tpu.dot_dimension_numbers<[1], [1], [0], [0], [0, 0, 1, 0], [], []>} : vector<256x8xbf16>, vector<256x8xbf16>, vector<256x256xf32> -> vector<256x256xf32>
    %c0_11 = arith.constant 0 : index
    %c0_12 = arith.constant 0 : index
    %7 = vector.load %arg6[%c0_11, %c0_12] : memref<1x256xf32, #tpu.memory_space<vmem>>, vector<1x256xf32>
    %8 = vector.broadcast %7 : vector<1x256xf32> to vector<256x256xf32>
    %9 = arith.addf %6, %8 : vector<256x256xf32>
    %cst_13 = arith.constant dense<0xFF800000> : vector<256xf32>
    %10 = vector.multi_reduction <maximumf>, %9, %cst_13 [1] : vector<256x256xf32> to vector<256xf32>
    %11 = vector.shape_cast %10 : vector<256xf32> to vector<256x1xf32>
    %12 = vector.broadcast %11 : vector<256x1xf32> to vector<256x256xf32>
    %13 = arith.subf %9, %12 : vector<256x256xf32>
    %14 = math.exp %13 : vector<256x256xf32>
    %cst_14 = arith.constant dense<0.000000e+00> : vector<256xf32>
    %15 = vector.multi_reduction <add>, %14, %cst_14 [1] : vector<256x256xf32> to vector<256xf32>
    %16 = vector.shape_cast %15 : vector<256xf32> to vector<256x1xf32>
    %17 = arith.truncf %14 : vector<256x256xf32> to vector<256x256xbf16>
    %cst_15 = arith.constant dense<0.000000e+00> : vector<256x8xf32>
    %18 = tpu.matmul %17, %5, %cst_15 {dimension_numbers = #tpu.dot_dimension_numbers<[1], [0], [0], [1], [0, 0, 1, 1], [], []>} : vector<256x256xbf16>, vector<256x8xbf16>, vector<256x8xf32> -> vector<256x8xf32>
    %19 = tpu.reciprocal %16 {approx = true} : vector<256x1xf32> -> vector<256x1xf32>
    %20 = vector.broadcast %19 : vector<256x1xf32> to vector<256x8xf32>
    %21 = arith.mulf %18, %20 : vector<256x8xf32>
    %22 = arith.truncf %21 : vector<256x8xf32> to vector<256x8xbf16>
    %c0_16 = arith.constant 0 : index
    %c0_17 = arith.constant 0 : index
    %c0_18 = arith.constant 0 : index
    %c0_19 = arith.constant 0 : index
    %23 = vector.load %arg7[%c0_16, %c0_17, %c0_18, %c0_19] : memref<1x1x256x8xbf16, #tpu.memory_space<vmem>>, vector<1x1x256x8xbf16>
    %24 = vector.shape_cast %23 : vector<1x1x256x8xbf16> to vector<256x8xbf16>
    %25 = vector.shape_cast %22 : vector<256x8xbf16> to vector<1x1x256x8xbf16>
    tpu.vector_store %arg7[%c0_16, %c0_17, %c0_18, %c0_19], %25 {strides = array<i32>} : memref<1x1x256x8xbf16, #tpu.memory_space<vmem>>, vector<1x1x256x8xbf16>,
    return
  }
  func.func @transform_0(%arg0: i32, %arg1: i32, %arg2: i32) -> (i32, i32, i32, i32) {
    %c0_i32 = arith.constant 0 : i32
    %c0_i32_0 = arith.constant 0 : i32
    return %arg0, %arg1, %arg2, %c0_i32 : i32, i32, i32, i32
  }
  func.func @transform_1(%arg0: i32, %arg1: i32, %arg2: i32) -> (i32, i32, i32, i32) {
    %c0_i32 = arith.constant 0 : i32
    %c0_i32_0 = arith.constant 0 : i32
    %c0_i32_1 = arith.constant 0 : i32
    return %arg0, %arg1, %c0_i32, %c0_i32_0 : i32, i32, i32, i32
  }
  func.func @transform_2(%arg0: i32, %arg1: i32, %arg2: i32) -> (i32, i32, i32, i32) {
    %c0_i32 = arith.constant 0 : i32
    %c0_i32_0 = arith.constant 0 : i32
    %c0_i32_1 = arith.constant 0 : i32
    return %arg0, %arg1, %c0_i32, %c0_i32_0 : i32, i32, i32, i32
  }
  func.func @transform_3(%arg0: i32, %arg1: i32, %arg2: i32) -> (i32, i32) {
    %c0_i32 = arith.constant 0 : i32
    %c0_i32_0 = arith.constant 0 : i32
    %c0_i32_1 = arith.constant 0 : i32
    return %c0_i32, %c0_i32_0 : i32, i32
  }
  func.func @transform_4(%arg0: i32, %arg1: i32, %arg2: i32) -> (i32, i32, i32, i32) {
    %c0_i32 = arith.constant 0 : i32
    %c0_i32_0 = arith.constant 0 : i32
    return %arg0, %arg1, %arg2, %c0_i32 : i32, i32, i32, i32
  }
}

module attributes {stable_mosaic.version = 11 : i64} {
  func.func @_qkv_proj_kernel(%arg0: i32, %arg1: i32, %arg2: i32, %arg3: memref<1x256x32xbf16, #tpu.memory_space<vmem>>, %arg4: memref<4x32x24xbf16, #tpu.memory_space<vmem>>, %arg5: memref<4x1x24xf32, #tpu.memory_space<vmem>>, %arg6: memref<1x1x256x8xbf16, #tpu.memory_space<vmem>>, %arg7: memref<1x1x256x8xbf16, #tpu.memory_space<vmem>>, %arg8: memref<1x1x256x8xbf16, #tpu.memory_space<vmem>>) attributes {dimension_semantics = [#tpu.dimension_semantics<parallel>, #tpu.dimension_semantics<parallel>, #tpu.dimension_semantics<parallel>], iteration_bounds = array<i64: 2, 1, 4>, scalar_prefetch = 0 : i64, scratch_operands = 0 : i64, tpu.core_type = #tpu.core_type<tc>, window_params = [{transform_indices = @transform_0, window_bounds = array<i64: 1, 256, 32>}, {pipeline_mode = #tpu.pipeline_mode<synchronous>, transform_indices = @transform_1, window_bounds = array<i64: 4, 32, 24>}, {pipeline_mode = #tpu.pipeline_mode<synchronous>, transform_indices = @transform_2, window_bounds = array<i64: 4, 1, 24>}, {transform_indices = @transform_3, window_bounds = array<i64: 1, 1, 256, 8>}, {transform_indices = @transform_4, window_bounds = array<i64: 1, 1, 256, 8>}, {transform_indices = @transform_5, window_bounds = array<i64: 1, 1, 256, 8>}]} {
    %c0 = arith.constant 0 : index
    %c0_0 = arith.constant 0 : index
    %c0_1 = arith.constant 0 : index
    %0 = vector.load %arg3[%c0, %c0_0, %c0_1] : memref<1x256x32xbf16, #tpu.memory_space<vmem>>, vector<1x256x32xbf16>
    %1 = vector.shape_cast %0 : vector<1x256x32xbf16> to vector<256x32xbf16>
    %2 = arith.index_cast %arg2 : i32 to index
    %c0_2 = arith.constant 0 : index
    %c0_3 = arith.constant 0 : index
    %3 = vector.load %arg4[%2, %c0_2, %c0_3] : memref<4x32x24xbf16, #tpu.memory_space<vmem>>, vector<1x32x24xbf16>
    %4 = vector.shape_cast %3 : vector<1x32x24xbf16> to vector<32x24xbf16>
    %cst = arith.constant dense<0.000000e+00> : vector<256x24xf32>
    %5 = tpu.matmul %1, %4, %cst {dimension_numbers = #tpu.dot_dimension_numbers<[1], [0], [0], [1], [0, 0, 1, 1], [], []>} : vector<256x32xbf16>, vector<32x24xbf16>, vector<256x24xf32> -> vector<256x24xf32>
    %6 = arith.index_cast %arg2 : i32 to index
    %c0_4 = arith.constant 0 : index
    %c0_5 = arith.constant 0 : index
    %7 = vector.load %arg5[%6, %c0_4, %c0_5] : memref<4x1x24xf32, #tpu.memory_space<vmem>>, vector<1x1x24xf32>
    %8 = vector.shape_cast %7 : vector<1x1x24xf32> to vector<1x24xf32>
    %9 = vector.broadcast %8 : vector<1x24xf32> to vector<256x24xf32>
    %10 = arith.addf %5, %9 : vector<256x24xf32>
    %11 = vector.extract_strided_slice %10 {offsets = [0, 0], sizes = [256, 8], strides = [1, 1]} : vector<256x24xf32> to vector<256x8xf32>
    %12 = arith.truncf %11 : vector<256x8xf32> to vector<256x8xbf16>
    %c0_6 = arith.constant 0 : index
    %c0_7 = arith.constant 0 : index
    %c0_8 = arith.constant 0 : index
    %c0_9 = arith.constant 0 : index
    %13 = vector.load %arg6[%c0_6, %c0_7, %c0_8, %c0_9] : memref<1x1x256x8xbf16, #tpu.memory_space<vmem>>, vector<1x1x256x8xbf16>
    %14 = vector.shape_cast %13 : vector<1x1x256x8xbf16> to vector<256x8xbf16>
    %15 = vector.shape_cast %12 : vector<256x8xbf16> to vector<1x1x256x8xbf16>
    tpu.vector_store %arg6[%c0_6, %c0_7, %c0_8, %c0_9], %15 {strides = array<i32>} : memref<1x1x256x8xbf16, #tpu.memory_space<vmem>>, vector<1x1x256x8xbf16>,
    %16 = vector.extract_strided_slice %10 {offsets = [0, 8], sizes = [256, 8], strides = [1, 1]} : vector<256x24xf32> to vector<256x8xf32>
    %17 = arith.truncf %16 : vector<256x8xf32> to vector<256x8xbf16>
    %c0_10 = arith.constant 0 : index
    %c0_11 = arith.constant 0 : index
    %c0_12 = arith.constant 0 : index
    %c0_13 = arith.constant 0 : index
    %18 = vector.load %arg7[%c0_10, %c0_11, %c0_12, %c0_13] : memref<1x1x256x8xbf16, #tpu.memory_space<vmem>>, vector<1x1x256x8xbf16>
    %19 = vector.shape_cast %18 : vector<1x1x256x8xbf16> to vector<256x8xbf16>
    %20 = vector.shape_cast %17 : vector<256x8xbf16> to vector<1x1x256x8xbf16>
    tpu.vector_store %arg7[%c0_10, %c0_11, %c0_12, %c0_13], %20 {strides = array<i32>} : memref<1x1x256x8xbf16, #tpu.memory_space<vmem>>, vector<1x1x256x8xbf16>,
    %21 = vector.extract_strided_slice %10 {offsets = [0, 16], sizes = [256, 8], strides = [1, 1]} : vector<256x24xf32> to vector<256x8xf32>
    %22 = arith.truncf %21 : vector<256x8xf32> to vector<256x8xbf16>
    %c0_14 = arith.constant 0 : index
    %c0_15 = arith.constant 0 : index
    %c0_16 = arith.constant 0 : index
    %c0_17 = arith.constant 0 : index
    %23 = vector.load %arg8[%c0_14, %c0_15, %c0_16, %c0_17] : memref<1x1x256x8xbf16, #tpu.memory_space<vmem>>, vector<1x1x256x8xbf16>
    %24 = vector.shape_cast %23 : vector<1x1x256x8xbf16> to vector<256x8xbf16>
    %25 = vector.shape_cast %22 : vector<256x8xbf16> to vector<1x1x256x8xbf16>
    tpu.vector_store %arg8[%c0_14, %c0_15, %c0_16, %c0_17], %25 {strides = array<i32>} : memref<1x1x256x8xbf16, #tpu.memory_space<vmem>>, vector<1x1x256x8xbf16>,
    return
  }
  func.func @transform_0(%arg0: i32, %arg1: i32, %arg2: i32) -> (i32, i32, i32) {
    %c0_i32 = arith.constant 0 : i32
    %c0_i32_0 = arith.constant 0 : i32
    return %arg0, %arg1, %c0_i32 : i32, i32, i32
  }
  func.func @transform_1(%arg0: i32, %arg1: i32, %arg2: i32) -> (i32, i32, i32) {
    %c0_i32 = arith.constant 0 : i32
    %c0_i32_0 = arith.constant 0 : i32
    %c0_i32_1 = arith.constant 0 : i32
    %c0_i32_2 = arith.constant 0 : i32
    return %c0_i32, %c0_i32_0, %c0_i32_1 : i32, i32, i32
  }
  func.func @transform_2(%arg0: i32, %arg1: i32, %arg2: i32) -> (i32, i32, i32) {
    %c0_i32 = arith.constant 0 : i32
    %c0_i32_0 = arith.constant 0 : i32
    %c0_i32_1 = arith.constant 0 : i32
    %c0_i32_2 = arith.constant 0 : i32
    return %c0_i32, %c0_i32_0, %c0_i32_1 : i32, i32, i32
  }
  func.func @transform_3(%arg0: i32, %arg1: i32, %arg2: i32) -> (i32, i32, i32, i32) {
    %c0_i32 = arith.constant 0 : i32
    %c0_i32_0 = arith.constant 0 : i32
    return %arg0, %arg2, %arg1, %c0_i32 : i32, i32, i32, i32
  }
  func.func @transform_4(%arg0: i32, %arg1: i32, %arg2: i32) -> (i32, i32, i32, i32) {
    %c0_i32 = arith.constant 0 : i32
    %c0_i32_0 = arith.constant 0 : i32
    return %arg0, %arg2, %arg1, %c0_i32 : i32, i32, i32, i32
  }
  func.func @transform_5(%arg0: i32, %arg1: i32, %arg2: i32) -> (i32, i32, i32, i32) {
    %c0_i32 = arith.constant 0 : i32
    %c0_i32_0 = arith.constant 0 : i32
    return %arg0, %arg2, %arg1, %c0_i32 : i32, i32, i32, i32
  }
}

module attributes {stable_mosaic.version = 11 : i64} {
  func.func @_proj_kernel(%arg0: i32, %arg1: i32, %arg2: memref<1x256x32xbf16, #tpu.memory_space<vmem>>, %arg3: memref<32x32xbf16, #tpu.memory_space<vmem>>, %arg4: memref<1x32xf32, #tpu.memory_space<vmem>>, %arg5: memref<1x256x32xf32, #tpu.memory_space<vmem>>) attributes {dimension_semantics = [#tpu.dimension_semantics<parallel>, #tpu.dimension_semantics<parallel>], iteration_bounds = array<i64: 2, 1>, scalar_prefetch = 0 : i64, scratch_operands = 0 : i64, tpu.core_type = #tpu.core_type<tc>, window_params = [{transform_indices = @transform_0, window_bounds = array<i64: 1, 256, 32>}, {pipeline_mode = #tpu.pipeline_mode<synchronous>, transform_indices = @transform_1, window_bounds = array<i64: 32, 32>}, {pipeline_mode = #tpu.pipeline_mode<synchronous>, transform_indices = @transform_2, window_bounds = array<i64: 1, 32>}, {transform_indices = @transform_3, window_bounds = array<i64: 1, 256, 32>}]} {
    %c0 = arith.constant 0 : index
    %c0_0 = arith.constant 0 : index
    %c0_1 = arith.constant 0 : index
    %0 = vector.load %arg2[%c0, %c0_0, %c0_1] : memref<1x256x32xbf16, #tpu.memory_space<vmem>>, vector<1x256x32xbf16>
    %1 = vector.shape_cast %0 : vector<1x256x32xbf16> to vector<256x32xbf16>
    %c0_2 = arith.constant 0 : index
    %c0_3 = arith.constant 0 : index
    %2 = vector.load %arg3[%c0_2, %c0_3] : memref<32x32xbf16, #tpu.memory_space<vmem>>, vector<32x32xbf16>
    %cst = arith.constant dense<0.000000e+00> : vector<256x32xf32>
    %3 = tpu.matmul %1, %2, %cst {dimension_numbers = #tpu.dot_dimension_numbers<[1], [0], [0], [1], [0, 0, 1, 1], [], []>} : vector<256x32xbf16>, vector<32x32xbf16>, vector<256x32xf32> -> vector<256x32xf32>
    %c0_4 = arith.constant 0 : index
    %c0_5 = arith.constant 0 : index
    %4 = vector.load %arg4[%c0_4, %c0_5] : memref<1x32xf32, #tpu.memory_space<vmem>>, vector<1x32xf32>
    %5 = vector.broadcast %4 : vector<1x32xf32> to vector<256x32xf32>
    %6 = arith.addf %3, %5 : vector<256x32xf32>
    %c0_6 = arith.constant 0 : index
    %c0_7 = arith.constant 0 : index
    %c0_8 = arith.constant 0 : index
    %7 = vector.load %arg5[%c0_6, %c0_7, %c0_8] : memref<1x256x32xf32, #tpu.memory_space<vmem>>, vector<1x256x32xf32>
    %8 = vector.shape_cast %7 : vector<1x256x32xf32> to vector<256x32xf32>
    %9 = vector.shape_cast %6 : vector<256x32xf32> to vector<1x256x32xf32>
    tpu.vector_store %arg5[%c0_6, %c0_7, %c0_8], %9 {strides = array<i32>} : memref<1x256x32xf32, #tpu.memory_space<vmem>>, vector<1x256x32xf32>,
    return
  }
  func.func @transform_0(%arg0: i32, %arg1: i32) -> (i32, i32, i32) {
    %c0_i32 = arith.constant 0 : i32
    %c0_i32_0 = arith.constant 0 : i32
    return %arg0, %arg1, %c0_i32 : i32, i32, i32
  }
  func.func @transform_1(%arg0: i32, %arg1: i32) -> (i32, i32) {
    %c0_i32 = arith.constant 0 : i32
    %c0_i32_0 = arith.constant 0 : i32
    %c0_i32_1 = arith.constant 0 : i32
    return %c0_i32, %c0_i32_0 : i32, i32
  }
  func.func @transform_2(%arg0: i32, %arg1: i32) -> (i32, i32) {
    %c0_i32 = arith.constant 0 : i32
    %c0_i32_0 = arith.constant 0 : i32
    %c0_i32_1 = arith.constant 0 : i32
    return %c0_i32, %c0_i32_0 : i32, i32
  }
  func.func @transform_3(%arg0: i32, %arg1: i32) -> (i32, i32, i32) {
    %c0_i32 = arith.constant 0 : i32
    %c0_i32_0 = arith.constant 0 : i32
    return %arg0, %arg1, %c0_i32 : i32, i32, i32
  }
}

</mosaic_0001>

<bundles_post_ra>
// kernel: _lambda_.5
= control target key start
LH: loop header
LB: loop body
LE: loop exit
PB: predicated region body
PF: predicated region fallthrough
CT: control target
= control target key end

     0   :  { %s867_s12 = smov 0   ;;  %s869_s13 = smov 0   ;;  %s1047_s0 = inlined_call_operand.vmem [shape: bf16[2,256,32], index: 0, kind: input, shape index: {}]   ;;  %s1048_s1 = inlined_call_operand.vmem [shape: bf16[32,32], index: 1, kind: input, shape index: {}]   ;;  %s1049_s2 = inlined_call_operand.vmem [shape: f32[1,32], index: 2, kind: input, shape index: {}]   ;;  %s1050_s3 = inlined_call_operand.vmem [shape: f32[2,256,32], index: 3, kind: output, shape index: {}]  }
   0x1   :  { %s871_s14 = smov 0  }
   0x2 LB: > { %s25_s15 = sadd.s32 1, %s841_s13  ;;  %p679_p0 = scmp.ge.s32.totalorder %s845_s14, 1  ;;  %s845_s14 = sphi %s871_s14, %s13_s14   ;;  %s841_s13 = sphi %s869_s13, %s1052_s13   ;;  %s837_s12 = sphi %s867_s12, %s1051_s12  }
   0x3   : > { %p27_p1 = scmp.ge.s32.totalorder %s25_s15, 2  ;;  %p158_p2 = scmp.lt.s32.totalorder %s845_s14, 3 }
   0x5   : > { %s1054_s15 = smov (%p27_p1, %s25_s15), 0  ;;  %p159_p3 = pnand %p679_p0, %p158_p2 }
   0x6   : > { %v805_v0 = vld [vmem:[%s1048_s1] sm:$0xff] (!%p159_p3)   ;;  %p191_p4 = scmp.lt.s32.totalorder (!%p159_p3), %s837_s12, 1  ;;  %v806_v1 = vld [vmem:[%s1048_s1 + $0x8] sm:$0xff] (!%p159_p3)   ;;  %vm346_vm0 = vcmask (!%p159_p3), 261120  }
   0x7   : > { %162 = sbr.rel (%p159_p3) target bundleno = 262 (0x106), region = 32  ;;  %741 = vmatprep.subr.bf16.mxu0 (!%p159_p3), %v805_v0  ;;  %777 = vmatprep.subr.bf16.mxu1 (!%p159_p3), %v805_v0  ;;  %v935_v18 = vld [vmem:[%s1049_s2] ss:$0 sm:$0xff] (!%p159_p3) }
   0x8   : > { %742 = vmatpush3.bf16.msra.mxu0 (!%p159_p3), %v805_v0  ;;  %779 = vmatpush3.bf16.msra.mxu1 (!%p159_p3), %v805_v0 }
   0x9   : > { %743 = vmatprep.subr.bf16.mxu0 (!%p159_p3), %v806_v1  ;;  %778 = vmatprep.subr.bf16.mxu1 (!%p159_p3), %v806_v1 }
   0xc   : > { %744 = vmatpush3.bf16.msra.mxu0 (!%p159_p3), %v806_v1  ;;  %780 = vmatpush3.bf16.msra.mxu1 (!%p159_p3), %v806_v1 }
   0xe   : > { %s1056_s12 = smov (!%p191_p4, %s837_s12), 1 }
   0xf   : > { %s721_s20 = sshll.u32 %s1056_s12, 7  ;;  %s722_s24 = sshll.u32 %s1056_s12, 8 }
  0x10   : > { %s897_s23 = scalar_lea.vmem %s1047_s0, %s721_s20  ;;  %s940_s29 = scalar_lea.vmem %s1050_s3, %s722_s24 }
  0x11   : > { %v807_v2 = vld [vmem:[%s897_s23] sm:$0xff]   ;;  %v809_v4 = vld [vmem:[%s897_s23 + $0x8] sm:$0xff]   ;;  %v811_v6 = vld [vmem:[%s897_s23 + $0x10] sm:$0xff]  }
  0x12   : > { %v808_v3 = vld [vmem:[%s897_s23 + $0x40] sm:$0xff]   ;;  %745 = vmatprep.mubr.msk.bf16.mxu0 %vm346_vm0, %v807_v2  ;;  %v810_v5 = vld [vmem:[%s897_s23 + $0x48] sm:$0xff]   ;;  %v812_v7 = vld [vmem:[%s897_s23 + $0x50] sm:$0xff]  }
  0x13   : > { %761 = vmatprep.mubr.msk.bf16.mxu1 %vm346_vm0, %v808_v3  ;;  %746 = vmatmul.mubr.msk.bf16.vlgmr.msra.gmra.mrb[0].mxu0 %vm346_vm0, %v809_v4  ;;  %v813_v8 = vld [vmem:[%s897_s23 + $0x18] sm:$0xff]   ;;  %v815_v10 = vld [vmem:[%s897_s23 + $0x20] sm:$0xff]   ;;  %v817_v12 = vld [vmem:[%s897_s23 + $0x28] sm:$0xff]  }
  0x14   : > { %762 = vmatmul.mubr.msk.bf16.vlgmr.msra.gmra.mrb[0].mxu1 %vm346_vm0, %v810_v5  ;;  %749 = vmatprep.mubr.msk.bf16.mxu0 %vm346_vm0, %v811_v6  ;;  %v814_v9 = vld [vmem:[%s897_s23 + $0x58] sm:$0xff]   ;;  %v816_v11 = vld [vmem:[%s897_s23 + $0x60] sm:$0xff]   ;;  %v818_v13 = vld [vmem:[%s897_s23 + $0x68] sm:$0xff]  }
  0x15   : > { %765 = vmatprep.mubr.msk.bf16.mxu1 %vm346_vm0, %v812_v7  ;;  %v819_v14 = vld [vmem:[%s897_s23 + $0x30] sm:$0xff]   ;;  %v821_v16 = vld [vmem:[%s897_s23 + $0x38] sm:$0xff]  }
  0x16   : > { %v820_v15 = vld [vmem:[%s897_s23 + $0x70] sm:$0xff]   ;;  %v822_v17 = vld [vmem:[%s897_s23 + $0x78] sm:$0xff]  }
  0x1b   : > { %750 = vmatmul.mubr.msk.bf16.gmra.mrb[4].mxu0 %vm346_vm0, %v813_v8 }
  0x1c   : > { %766 = vmatmul.mubr.msk.bf16.gmra.mrb[4].mxu1 %vm346_vm0, %v814_v9  ;;  %753 = vmatprep.mubr.msk.bf16.mxu0 %vm346_vm0, %v815_v10 }
  0x1d   : > { %769 = vmatprep.mubr.msk.bf16.mxu1 %vm346_vm0, %v816_v11 }
  0x23   : > { %754 = vmatmul.mubr.msk.bf16.gmra.mrb[8].mxu0 %vm346_vm0, %v817_v12 }
  0x24   : > { %770 = vmatmul.mubr.msk.bf16.gmra.mrb[8].mxu1 %vm346_vm0, %v818_v13  ;;  %757 = vmatprep.mubr.msk.bf16.mxu0 %vm346_vm0, %v819_v14 }
  0x25   : > { %773 = vmatprep.mubr.msk.bf16.mxu1 %vm346_vm0, %v820_v15 }
  0x2b   : > { %758 = vmatmul.mubr.msk.bf16.gmra.mrb[12].mxu0 %vm346_vm0, %v821_v16 }
  0x2c   : > { %774 = vmatmul.mubr.msk.bf16.gmra.mrb[12].mxu1 %vm346_vm0, %v822_v17 }
  0xe6   : > { %v747_v19 = vpop.f32.mrb[0].mxu0 }
  0xe7   : > { %v438_v20 = vadd.f32 %v747_v19, %v935_v18  ;;  %v763_v21 = vpop.f32.mrb[0].mxu1  ;;  %v429_v22 = vpop.f32.mrb[1].mxu0 }
  0xe8   : > { %v502_v23 = vadd.f32 %v763_v21, %v935_v18  ;;  %v430_v24 = vadd.f32 %v935_v18, %v429_v22  ;;  %v493_v25 = vpop.f32.mrb[1].mxu1  ;;  %v748_v26 = vpop.f32.mrb[2].mxu0 }
  0xe9   : > { %558 = vst.msk [vmem:[%s940_s29 + $0x10] sm:$0xff] %vm346_vm0, %v438_v20  ;;  %v494_v27 = vadd.f32 %v935_v18, %v493_v25  ;;  %v441_v28 = vadd.f32 %v748_v26, %v935_v18  ;;  %v764_v29 = vpop.f32.mrb[2].mxu1  ;;  %v432_v30 = vpop.f32.mrb[3].mxu0 }
  0xea   : > { %574 = vst.msk [vmem:[%s940_s29 + $0x90] sm:$0xff] %vm346_vm0, %v502_v23  ;;  %556 = vst.msk [vmem:[%s940_s29] sm:$0xff] %vm346_vm0, %v430_v24  ;;  %v505_v31 = vadd.f32 %v764_v29, %v935_v18  ;;  %v433_v32 = vadd.f32 %v935_v18, %v432_v30  ;;  %v496_v33 = vpop.f32.mrb[3].mxu1 }
  0xeb   : > { %572 = vst.msk [vmem:[%s940_s29 + $0x80] sm:$0xff] %vm346_vm0, %v494_v27  ;;  %559 = vst.msk [vmem:[%s940_s29 + $0x18] sm:$0xff] %vm346_vm0, %v441_v28  ;;  %v497_v34 = vadd.f32 %v935_v18, %v496_v33 }
  0xec   : > { %575 = vst.msk [vmem:[%s940_s29 + $0x98] sm:$0xff] %vm346_vm0, %v505_v31  ;;  %557 = vst.msk [vmem:[%s940_s29 + $0x8] sm:$0xff] %vm346_vm0, %v433_v32 }
  0xed   : > { %573 = vst.msk [vmem:[%s940_s29 + $0x88] sm:$0xff] %vm346_vm0, %v497_v34 }
  0xee   : > { %v751_v35 = vpop.f32.mrb[4].mxu0 }
  0xef   : > { %v454_v36 = vadd.f32 %v751_v35, %v935_v18  ;;  %v767_v37 = vpop.f32.mrb[4].mxu1  ;;  %v445_v38 = vpop.f32.mrb[5].mxu0 }
  0xf0   : > { %v518_v39 = vadd.f32 %v767_v37, %v935_v18  ;;  %v446_v40 = vadd.f32 %v935_v18, %v445_v38  ;;  %v509_v41 = vpop.f32.mrb[5].mxu1  ;;  %v752_v42 = vpop.f32.mrb[6].mxu0 }
  0xf1   : > { %562 = vst.msk [vmem:[%s940_s29 + $0x30] sm:$0xff] %vm346_vm0, %v454_v36  ;;  %v510_v43 = vadd.f32 %v935_v18, %v509_v41  ;;  %v457_v44 = vadd.f32 %v752_v42, %v935_v18  ;;  %v768_v45 = vpop.f32.mrb[6].mxu1  ;;  %v448_v46 = vpop.f32.mrb[7].mxu0 }
  0xf2   : > { %578 = vst.msk [vmem:[%s940_s29 + $0xb0] sm:$0xff] %vm346_vm0, %v518_v39  ;;  %560 = vst.msk [vmem:[%s940_s29 + $0x20] sm:$0xff] %vm346_vm0, %v446_v40  ;;  %v521_v47 = vadd.f32 %v768_v45, %v935_v18  ;;  %v449_v48 = vadd.f32 %v935_v18, %v448_v46  ;;  %v512_v49 = vpop.f32.mrb[7].mxu1 }
  0xf3   : > { %576 = vst.msk [vmem:[%s940_s29 + $0xa0] sm:$0xff] %vm346_vm0, %v510_v43  ;;  %563 = vst.msk [vmem:[%s940_s29 + $0x38] sm:$0xff] %vm346_vm0, %v457_v44  ;;  %v513_v50 = vadd.f32 %v935_v18, %v512_v49 }
  0xf4   : > { %579 = vst.msk [vmem:[%s940_s29 + $0xb8] sm:$0xff] %vm346_vm0, %v521_v47  ;;  %561 = vst.msk [vmem:[%s940_s29 + $0x28] sm:$0xff] %vm346_vm0, %v449_v48 }
  0xf5   : > { %577 = vst.msk [vmem:[%s940_s29 + $0xa8] sm:$0xff] %vm346_vm0, %v513_v50 }
  0xf6   : > { %v755_v51 = vpop.f32.mrb[8].mxu0 }
  0xf7   : > { %v470_v52 = vadd.f32 %v755_v51, %v935_v18  ;;  %v771_v53 = vpop.f32.mrb[8].mxu1  ;;  %v461_v54 = vpop.f32.mrb[9].mxu0 }
  0xf8   : > { %v534_v55 = vadd.f32 %v771_v53, %v935_v18  ;;  %v462_v56 = vadd.f32 %v935_v18, %v461_v54  ;;  %v525_v57 = vpop.f32.mrb[9].mxu1  ;;  %v756_v58 = vpop.f32.mrb[10].mxu0 }
  0xf9   : > { %566 = vst.msk [vmem:[%s940_s29 + $0x50] sm:$0xff] %vm346_vm0, %v470_v52  ;;  %v526_v59 = vadd.f32 %v935_v18, %v525_v57  ;;  %v473_v60 = vadd.f32 %v756_v58, %v935_v18  ;;  %v772_v61 = vpop.f32.mrb[10].mxu1  ;;  %v464_v62 = vpop.f32.mrb[11].mxu0 }
  0xfa   : > { %582 = vst.msk [vmem:[%s940_s29 + $0xd0] sm:$0xff] %vm346_vm0, %v534_v55  ;;  %564 = vst.msk [vmem:[%s940_s29 + $0x40] sm:$0xff] %vm346_vm0, %v462_v56  ;;  %v537_v63 = vadd.f32 %v772_v61, %v935_v18  ;;  %v465_v0 = vadd.f32 %v935_v18, %v464_v62  ;;  %v528_v1 = vpop.f32.mrb[11].mxu1 }
  0xfb   : > { %580 = vst.msk [vmem:[%s940_s29 + $0xc0] sm:$0xff] %vm346_vm0, %v526_v59  ;;  %567 = vst.msk [vmem:[%s940_s29 + $0x58] sm:$0xff] %vm346_vm0, %v473_v60  ;;  %v529_v2 = vadd.f32 %v935_v18, %v528_v1 }
  0xfc   : > { %583 = vst.msk [vmem:[%s940_s29 + $0xd8] sm:$0xff] %vm346_vm0, %v537_v63  ;;  %565 = vst.msk [vmem:[%s940_s29 + $0x48] sm:$0xff] %vm346_vm0, %v465_v0 }
  0xfd   : > { %581 = vst.msk [vmem:[%s940_s29 + $0xc8] sm:$0xff] %vm346_vm0, %v529_v2 }
  0xfe   : > { %v759_v3 = vpop.f32.mrb[12].mxu0 }
  0xff   : > { %v486_v4 = vadd.f32 %v759_v3, %v935_v18  ;;  %v775_v5 = vpop.f32.mrb[12].mxu1  ;;  %v477_v6 = vpop.f32.mrb[13].mxu0 }
 0x100   : > { %v550_v7 = vadd.f32 %v775_v5, %v935_v18  ;;  %v478_v8 = vadd.f32 %v935_v18, %v477_v6  ;;  %v541_v9 = vpop.f32.mrb[13].mxu1  ;;  %v760_v10 = vpop.f32.mrb[14].mxu0 }
 0x101   : > { %570 = vst.msk [vmem:[%s940_s29 + $0x70] sm:$0xff] %vm346_vm0, %v486_v4  ;;  %v542_v11 = vadd.f32 %v935_v18, %v541_v9  ;;  %v489_v12 = vadd.f32 %v760_v10, %v935_v18  ;;  %v776_v13 = vpop.f32.mrb[14].mxu1  ;;  %v480_v14 = vpop.f32.mrb[15].mxu0 }
 0x102   : > { %586 = vst.msk [vmem:[%s940_s29 + $0xf0] sm:$0xff] %vm346_vm0, %v550_v7  ;;  %568 = vst.msk [vmem:[%s940_s29 + $0x60] sm:$0xff] %vm346_vm0, %v478_v8  ;;  %v553_v15 = vadd.f32 %v776_v13, %v935_v18  ;;  %v481_v16 = vadd.f32 %v935_v18, %v480_v14  ;;  %v544_v17 = vpop.f32.mrb[15].mxu1 }
 0x103   : > { %584 = vst.msk [vmem:[%s940_s29 + $0xe0] sm:$0xff] %vm346_vm0, %v542_v11  ;;  %571 = vst.msk [vmem:[%s940_s29 + $0x78] sm:$0xff] %vm346_vm0, %v489_v12  ;;  %v545_v19 = vadd.f32 %v935_v18, %v544_v17 }
 0x104   : > { %587 = vst.msk [vmem:[%s940_s29 + $0xf8] sm:$0xff] %vm346_vm0, %v553_v15  ;;  %569 = vst.msk [vmem:[%s940_s29 + $0x68] sm:$0xff] %vm346_vm0, %v481_v16 }
 0x105   : > { %585 = vst.msk [vmem:[%s940_s29 + $0xe8] sm:$0xff] %vm346_vm0, %v545_v19 }
 0x106 PF: > { %s13_s14 = sadd.s32 1, %s845_s14   ;;  %s1051_s12 = smov %s841_s13 }
 0x107   : > { %p10_p5 = scmp.ge.s32.totalorder %s13_s14, 4   ;;  %s1052_s13 = smov %s1054_s15 }
 0x109   :  { %12 = sbr.rel (!%p10_p5) target bundleno = 2 (0x2), region = 62 }

// kernel: _lambda_.3
= control target key start
LH: loop header
LB: loop body
LE: loop exit
PB: predicated region body
PF: predicated region fallthrough
CT: control target
= control target key end

     0   :  { %s1670_s18 = smov 0   ;;  %s1672_s19 = smov 0   ;;  %s2206_s0 = inlined_call_operand.vmem [shape: bf16[2,256,32], index: 0, kind: input, shape index: {}]   ;;  %s2207_s1 = inlined_call_operand.vmem [shape: bf16[4,32,24], index: 1, kind: input, shape index: {}]   ;;  %s2208_s2 = inlined_call_operand.vmem [shape: f32[4,1,24], index: 2, kind: input, shape index: {}]   ;;  %s2209_s3 = inlined_call_operand.vmem [shape: bf16[2,4,256,8], index: 3, kind: output, shape index: {0}]   ;;  %s2210_s4 = inlined_call_operand.vmem [shape: bf16[2,4,256,8], index: 4, kind: output, shape index: {1}]   ;;  %s2211_s5 = inlined_call_operand.vmem [shape: bf16[2,4,256,8], index: 5, kind: output, shape index: {2}]  }
   0x1   :  { %s1674_s20 = smov 0   ;;  %s1676_s21 = smov 0  }
   0x2   :  { %s1678_s22 = smov 0  }
   0x3 LB: > { %s28_s23 = sadd.s32 1, %s1628_s20  ;;  %s35_s24 = sadd.s32 1, %s1632_s21  ;;  %s1636_s22 = sphi %s1678_s22, %s16_s22   ;;  %s1632_s21 = sphi %s1676_s21, %s2215_s21   ;;  %s1628_s20 = sphi %s1674_s20, %s2214_s20   ;;  %s1624_s19 = sphi %s1672_s19, %s2213_s19   ;;  %s1620_s18 = sphi %s1670_s18, %s2212_s18  }
   0x4   : > { %p29_p0 = scmp.ge.s32.totalorder %s28_s23, 4  ;;  %p1363_p1 = scmp.ge.s32.totalorder %s1636_s22, 1 }
   0x5   : > { %p230_p2 = scmp.lt.s32.totalorder %s1636_s22, 9 }
   0x6   : > { %s2217_s23 = smov (%p29_p0, %s28_s23), 0  ;;  %s2219_s24 = smov (!%p29_p0, %s35_s24), %s1632_s21 }
   0x7   : > { %p231_p3 = pnand %p1363_p1, %p230_p2  ;;  %p37_p4 = scmp.ge.s32.totalorder %s2219_s24, 2 }
   0x8   : > { %s1447_s25 = sshll.u32 (!%p231_p3), %s1620_s18, 4  ;;  %p297_p5 = scmp.lt.s32.totalorder (!%p231_p3), %s1624_s19, 1  ;;  %vm488_vm0 = vcmask (!%p231_p3), 261120   ;;  %vm826_vm1 = vcmask (!%p231_p3), 60416  }
   0x9   : > { %s2221_s24 = smov (%p37_p4, %s2219_s24), 0  ;;  %234 = sbr.rel (%p231_p3) target bundleno = 478 (0x1de), region = 32 }
   0xa   : > { %s383_s28 = scalar_lea.vmem (!%p231_p3), %s2207_s1, %s1447_s25  ;;  %p309_p6 = scmp.lt.s32.totalorder (!%p231_p3), %s1620_s18, 3 }
   0xb   : > { %v1580_v0 = vld [vmem:[%s383_s28] sm:$0xff] (!%p231_p3)   ;;  %v1581_v1 = vld [vmem:[%s383_s28 + $0x8] sm:$0xff] (!%p231_p3)   ;;  %s388_s12 = scalar_lea.vmem (!%p231_p3), %s2208_s2, %s1620_s18 }
   0xc   : > { %1498 = vmatprep.subr.bf16.mxu0 (!%p231_p3), %v1580_v0  ;;  %1534 = vmatprep.subr.bf16.mxu1 (!%p231_p3), %v1580_v0  ;;  %v1756_v18 = vld [vmem:[%s388_s12] ss:$0 sm:$0xff] (!%p231_p3) }
   0xd   : > { %1499 = vmatpush3.bf16.msra.mxu0 (!%p231_p3), %v1580_v0  ;;  %1536 = vmatpush3.bf16.msra.mxu1 (!%p231_p3), %v1580_v0 }
   0xe   : > { %1500 = vmatprep.subr.bf16.mxu0 (!%p231_p3), %v1581_v1  ;;  %1535 = vmatprep.subr.bf16.mxu1 (!%p231_p3), %v1581_v1 }
  0x10   : > { %s2223_s19 = smov (!%p297_p5, %s1624_s19), 1 }
  0x11   : > { %s1446_s29 = sshll.u32 %s2223_s19, 7  ;;  %1501 = vmatpush3.bf16.msra.mxu0 %v1581_v1  ;;  %1537 = vmatpush3.bf16.msra.mxu1 %v1581_v1  ;;  %s1639_s19 = smov 112  }
  0x12   : > { %s1714_s7 = scalar_lea.vmem %s2206_s0, %s1446_s29 }
  0x13   : > { %v1582_v2 = vld [vmem:[%s1714_s7] sm:$0xff]   ;;  %v1584_v4 = vld [vmem:[%s1714_s7 + $0x8] sm:$0xff]   ;;  %v1586_v6 = vld [vmem:[%s1714_s7 + $0x10] sm:$0xff]   ;;  %s310_s8 = scalar_select %p309_p6, %s1620_s18, 3 }
  0x14   : > { %v1583_v3 = vld [vmem:[%s1714_s7 + $0x40] sm:$0xff]   ;;  %1502 = vmatprep.mubr.msk.bf16.mxu0 %vm488_vm0, %v1582_v2  ;;  %v1585_v5 = vld [vmem:[%s1714_s7 + $0x48] sm:$0xff]   ;;  %v1588_v7 = vld [vmem:[%s1714_s7 + $0x50] sm:$0xff]   ;;  %s1638_s18 = smov 120  }
  0x15   : > { %1518 = vmatprep.mubr.msk.bf16.mxu1 %vm488_vm0, %v1583_v3  ;;  %1503 = vmatmul.mubr.msk.bf16.vlgmr.msra.gmra.mrb[0].mxu0 %vm488_vm0, %v1584_v4  ;;  %v1587_v8 = vld [vmem:[%s1714_s7 + $0x18] sm:$0xff]   ;;  %v1590_v10 = vld [vmem:[%s1714_s7 + $0x20] sm:$0xff]   ;;  %v1591_v12 = vld [vmem:[%s1714_s7 + $0x28] sm:$0xff]   ;;  %s1366_s9 = sshll.u32 %s310_s8, 5 }
  0x16   : > { %1519 = vmatmul.mubr.msk.bf16.vlgmr.msra.gmra.mrb[0].mxu1 %vm488_vm0, %v1585_v5  ;;  %1506 = vmatprep.mubr.msk.bf16.mxu0 %vm488_vm0, %v1586_v6  ;;  %v1589_v9 = vld [vmem:[%s1714_s7 + $0x58] sm:$0xff]   ;;  %v1592_v11 = vld [vmem:[%s1714_s7 + $0x60] sm:$0xff]   ;;  %v1593_v13 = vld [vmem:[%s1714_s7 + $0x68] sm:$0xff]   ;;  %s316_s13 = sadd.s32 %s1446_s29, %s1366_s9 }
  0x17   : > { %1522 = vmatprep.mubr.msk.bf16.mxu1 %vm488_vm0, %v1588_v7  ;;  %v1594_v14 = vld [vmem:[%s1714_s7 + $0x30] sm:$0xff]   ;;  %v1595_v16 = vld [vmem:[%s1714_s7 + $0x38] sm:$0xff]   ;;  %s1758_s14 = sshll.u32 %s316_s13, 2 }
  0x18   : > { %v1596_v15 = vld [vmem:[%s1714_s7 + $0x70] sm:$0xff]   ;;  %v1597_v17 = vld [vmem:[%s1714_s7 + $0x78] sm:$0xff]   ;;  %s1766_s17 = scalar_lea.vmem %s2209_s3, %s1758_s14  ;;  %s2045_s27 = scalar_lea.vmem %s2210_s4, %s1758_s14 }
  0x19   : > { %s2058_s30 = scalar_lea.vmem %s2211_s5, %s1758_s14 }
  0x1d   : > { %1507 = vmatmul.mubr.msk.bf16.gmra.mrb[4].mxu0 %vm488_vm0, %v1587_v8 }
  0x1e   : > { %1523 = vmatmul.mubr.msk.bf16.gmra.mrb[4].mxu1 %vm488_vm0, %v1589_v9  ;;  %1510 = vmatprep.mubr.msk.bf16.mxu0 %vm488_vm0, %v1590_v10 }
  0x1f   : > { %1526 = vmatprep.mubr.msk.bf16.mxu1 %vm488_vm0, %v1592_v11 }
  0x25   : > { %1511 = vmatmul.mubr.msk.bf16.gmra.mrb[8].mxu0 %vm488_vm0, %v1591_v12 }
  0x26   : > { %1527 = vmatmul.mubr.msk.bf16.gmra.mrb[8].mxu1 %vm488_vm0, %v1593_v13  ;;  %1514 = vmatprep.mubr.msk.bf16.mxu0 %vm488_vm0, %v1594_v14 }
  0x27   : > { %1530 = vmatprep.mubr.msk.bf16.mxu1 %vm488_vm0, %v1596_v15 }
  0x2d   : > { %1515 = vmatmul.mubr.msk.bf16.gmra.mrb[12].mxu0 %vm488_vm0, %v1595_v16 }
  0x2e   : > { %1531 = vmatmul.mubr.msk.bf16.gmra.mrb[12].mxu1 %vm488_vm0, %v1597_v17 }
  0xe8   : > { %v1504_v19 = vpop.f32.mrb[0].mxu0 }
  0xe9   : > { %v1520_v20 = vpop.f32.mrb[0].mxu1  ;;  %v580_v21 = vadd.f32 %v1504_v19, %v1756_v18  ;;  %v571_v23 = vpop.f32.mrb[1].mxu0 }
  0xea   : > { %v644_v22 = vadd.f32 %v1520_v20, %v1756_v18  ;;  %v635_v24 = vpop.f32.mrb[1].mxu1  ;;  %v572_v25 = vadd.f32 %v1756_v18, %v571_v23  ;;  %v1505_v27 = vpop.f32.mrb[2].mxu0 }
  0xeb   : > { %v636_v26 = vadd.f32 %v1756_v18, %v635_v24  ;;  %v1521_v28 = vpop.f32.mrb[2].mxu1  ;;  %v1450_v29 = vpack.c.bf16 %v580_v21, %v580_v21  ;;  %v583_v31 = vadd.f32 %v1505_v27, %v1756_v18  ;;  %v574_v33 = vpop.f32.mrb[3].mxu0 }
  0xec   : > { %v1466_v30 = vpack.c.bf16 %v644_v22, %v644_v22  ;;  %v647_v32 = vadd.f32 %v1521_v28, %v1756_v18  ;;  %v638_v34 = vpop.f32.mrb[3].mxu1  ;;  %v1772_v35 = vpack.c.bf16 %v572_v25, %v572_v25  ;;  %v575_v37 = vadd.f32 %v1756_v18, %v574_v33 }
  0xed   : > { %v1774_v36 = vpack.c.bf16 %v636_v26, %v636_v26  ;;  %v639_v38 = vadd.f32 %v1756_v18, %v638_v34  ;;  %829 = vst.msk [vmem:[%s1766_s17 + $0x8] sm:$0xf] %vm826_vm1, %v1450_v29  ;;  %v1451_v39 = vpack.c.bf16 %v583_v31, %v583_v31  ;;  %863 = vrot.lane.b32.xlu1 %v1450_v29, %s1638_s18 }
  0xee   : > { %845 = vst.msk [vmem:[%s1766_s17 + $0x48] sm:$0xf] %vm826_vm1, %v1466_v30  ;;  %v1782_v40 = vpack.c.bf16 %v647_v32, %v647_v32  ;;  %895 = vrot.lane.b32.xlu0 %v1466_v30, %s1638_s18  ;;  %827 = vst.msk [vmem:[%s1766_s17] sm:$0xf] %vm826_vm1, %v1772_v35  ;;  %v1792_v41 = vpack.c.bf16 %v575_v37, %v575_v37 }
  0xef   : > { %843 = vst.msk [vmem:[%s1766_s17 + $0x40] sm:$0xf] %vm826_vm1, %v1774_v36  ;;  %v1794_v42 = vpack.c.bf16 %v639_v38, %v639_v38  ;;  %830 = vst.msk [vmem:[%s1766_s17 + $0xc] sm:$0xf] %vm826_vm1, %v1451_v39 }
  0xf0   : > { %846 = vst.msk [vmem:[%s1766_s17 + $0x4c] sm:$0xf] %vm826_vm1, %v1782_v40  ;;  %828 = vst.msk [vmem:[%s1766_s17 + $0x4] sm:$0xf] %vm826_vm1, %v1792_v41  ;;  %v1508_v43 = vpop.f32.mrb[4].mxu0 }
  0xf1   : > { %844 = vst.msk [vmem:[%s1766_s17 + $0x44] sm:$0xf] %vm826_vm1, %v1794_v42  ;;  %v1524_v44 = vpop.f32.mrb[4].mxu1  ;;  %865 = vrot.lane.b32.xlu1 %v1451_v39, %s1638_s18  ;;  %v596_v45 = vadd.f32 %v1508_v43, %v1756_v18  ;;  %v587_v46 = vpop.f32.mrb[5].mxu0 }
  0xf2   : > { %991 = vrot.lane.b32.xlu0 %v1450_v29, %s1639_s19  ;;  %v660_v47 = vadd.f32 %v1524_v44, %v1756_v18  ;;  %v651_v48 = vpop.f32.mrb[5].mxu1  ;;  %v588_v49 = vadd.f32 %v1756_v18, %v587_v46  ;;  %v1509_v50 = vpop.f32.mrb[6].mxu0 }
  0xf3   : > { %v652_v51 = vadd.f32 %v1756_v18, %v651_v48  ;;  %v1525_v52 = vpop.f32.mrb[6].mxu1  ;;  %v1813_v53 = vpack.c.bf16 %v596_v45, %v596_v45  ;;  %v599_v54 = vadd.f32 %v1509_v50, %v1756_v18  ;;  %v590_v55 = vpop.f32.mrb[7].mxu0 }
  0xf4   : > { %v1816_v56 = vpack.c.bf16 %v660_v47, %v660_v47  ;;  %v663_v57 = vadd.f32 %v1525_v52, %v1756_v18  ;;  %v654_v58 = vpop.f32.mrb[7].mxu1  ;;  %v1819_v59 = vpack.c.bf16 %v588_v49, %v588_v49  ;;  %v591_v60 = vadd.f32 %v1756_v18, %v590_v55 }
  0xf5   : > { %v1822_v61 = vpack.c.bf16 %v652_v51, %v652_v51  ;;  %v655_v62 = vadd.f32 %v1756_v18, %v654_v58  ;;  %897 = vrot.lane.b32.xlu1 %v1782_v40, %s1638_s18  ;;  %833 = vst.msk [vmem:[%s1766_s17 + $0x18] sm:$0xf] %vm826_vm1, %v1813_v53  ;;  %v1831_v63 = vpack.c.bf16 %v599_v54, %v599_v54 }
  0xf6   : > { %1023 = vrot.lane.b32.xlu0 %v1466_v30, %s1639_s19  ;;  %849 = vst.msk [vmem:[%s1766_s17 + $0x58] sm:$0xf] %vm826_vm1, %v1816_v56  ;;  %v1836_v0 = vpack.c.bf16 %v663_v57, %v663_v57  ;;  %831 = vst.msk [vmem:[%s1766_s17 + $0x10] sm:$0xf] %vm826_vm1, %v1819_v59  ;;  %v1841_v1 = vpack.c.bf16 %v591_v60, %v591_v60 }
  0xf7   : > { %847 = vst.msk [vmem:[%s1766_s17 + $0x50] sm:$0xf] %vm826_vm1, %v1822_v61  ;;  %v1846_v2 = vpack.c.bf16 %v655_v62, %v655_v62  ;;  %834 = vst.msk [vmem:[%s1766_s17 + $0x1c] sm:$0xf] %vm826_vm1, %v1831_v63 }
  0xf8   : > { %850 = vst.msk [vmem:[%s1766_s17 + $0x5c] sm:$0xf] %vm826_vm1, %v1836_v0  ;;  %832 = vst.msk [vmem:[%s1766_s17 + $0x14] sm:$0xf] %vm826_vm1, %v1841_v1  ;;  %v1512_v3 = vpop.f32.mrb[8].mxu0 }
  0xf9   : > { %848 = vst.msk [vmem:[%s1766_s17 + $0x54] sm:$0xf] %vm826_vm1, %v1846_v2  ;;  %v1528_v4 = vpop.f32.mrb[8].mxu1  ;;  %993 = vrot.lane.b32.xlu1 %v1451_v39, %s1639_s19  ;;  %v612_v5 = vadd.f32 %v1512_v3, %v1756_v18  ;;  %v603_v6 = vpop.f32.mrb[9].mxu0 }
  0xfa   : > { %859 = vrot.lane.b32.xlu0 %v1772_v35, %s1638_s18  ;;  %v676_v7 = vadd.f32 %v1528_v4, %v1756_v18  ;;  %v667_v8 = vpop.f32.mrb[9].mxu1  ;;  %v604_v9 = vadd.f32 %v1756_v18, %v603_v6  ;;  %v1513_v10 = vpop.f32.mrb[10].mxu0 }
  0xfb   : > { %v668_v11 = vadd.f32 %v1756_v18, %v667_v8  ;;  %v1529_v12 = vpop.f32.mrb[10].mxu1  ;;  %v1867_v13 = vpack.c.bf16 %v612_v5, %v612_v5  ;;  %v615_v14 = vadd.f32 %v1513_v10, %v1756_v18  ;;  %v606_v15 = vpop.f32.mrb[11].mxu0 }
  0xfc   : > { %v1870_v16 = vpack.c.bf16 %v676_v7, %v676_v7  ;;  %v679_v17 = vadd.f32 %v1529_v12, %v1756_v18  ;;  %v670_v19 = vpop.f32.mrb[11].mxu1  ;;  %v1873_v20 = vpack.c.bf16 %v604_v9, %v604_v9  ;;  %v607_v21 = vadd.f32 %v1756_v18, %v606_v15 }
  0xfd   : > { %v1876_v22 = vpack.c.bf16 %v668_v11, %v668_v11  ;;  %v671_v23 = vadd.f32 %v1756_v18, %v670_v19  ;;  %1025 = vrot.lane.b32.xlu1 %v1782_v40, %s1639_s19  ;;  %837 = vst.msk [vmem:[%s1766_s17 + $0x28] sm:$0xf] %vm826_vm1, %v1867_v13  ;;  %v1886_v24 = vpack.c.bf16 %v615_v14, %v615_v14 }
  0xfe   : > { %891 = vrot.lane.b32.xlu0 %v1774_v36, %s1638_s18  ;;  %853 = vst.msk [vmem:[%s1766_s17 + $0x68] sm:$0xf] %vm826_vm1, %v1870_v16  ;;  %v1891_v25 = vpack.c.bf16 %v679_v17, %v679_v17  ;;  %835 = vst.msk [vmem:[%s1766_s17 + $0x20] sm:$0xf] %vm826_vm1, %v1873_v20  ;;  %v1896_v26 = vpack.c.bf16 %v607_v21, %v607_v21 }
  0xff   : > { %851 = vst.msk [vmem:[%s1766_s17 + $0x60] sm:$0xf] %vm826_vm1, %v1876_v22  ;;  %v1901_v27 = vpack.c.bf16 %v671_v23, %v671_v23  ;;  %838 = vst.msk [vmem:[%s1766_s17 + $0x2c] sm:$0xf] %vm826_vm1, %v1886_v24 }
 0x100   : > { %854 = vst.msk [vmem:[%s1766_s17 + $0x6c] sm:$0xf] %vm826_vm1, %v1891_v25  ;;  %836 = vst.msk [vmem:[%s1766_s17 + $0x24] sm:$0xf] %vm826_vm1, %v1896_v26  ;;  %v1516_v28 = vpop.f32.mrb[12].mxu0 }
 0x101   : > { %852 = vst.msk [vmem:[%s1766_s17 + $0x64] sm:$0xf] %vm826_vm1, %v1901_v27  ;;  %v1532_v29 = vpop.f32.mrb[12].mxu1  ;;  %893 = vrot.lane.b32.xlu1 %v1794_v42, %s1638_s18  ;;  %v628_v30 = vadd.f32 %v1516_v28, %v1756_v18  ;;  %v619_v31 = vpop.f32.mrb[13].mxu0 }
 0x102   : > { %987 = vrot.lane.b32.xlu0 %v1772_v35, %s1639_s19  ;;  %v692_v32 = vadd.f32 %v1532_v29, %v1756_v18  ;;  %v683_v33 = vpop.f32.mrb[13].mxu1  ;;  %v620_v34 = vadd.f32 %v1756_v18, %v619_v31  ;;  %v1517_v37 = vpop.f32.mrb[14].mxu0 }
 0x103   : > { %v684_v38 = vadd.f32 %v1756_v18, %v683_v33  ;;  %v1533_v39 = vpop.f32.mrb[14].mxu1  ;;  %v1462_v40 = vpack.c.bf16 %v628_v30, %v628_v30  ;;  %v631_v43 = vadd.f32 %v1517_v37, %v1756_v18  ;;  %v622_v44 = vpop.f32.mrb[15].mxu0 }
 0x104   : > { %v1924_v35 = vpack.c.bf16 %v692_v32, %v692_v32  ;;  %v695_v45 = vadd.f32 %v1533_v39, %v1756_v18  ;;  %v686_v46 = vpop.f32.mrb[15].mxu1  ;;  %v1927_v47 = vpack.c.bf16 %v620_v34, %v620_v34  ;;  %v623_v48 = vadd.f32 %v1756_v18, %v622_v44 }
 0x105   : > { %v1930_v49 = vpack.c.bf16 %v684_v38, %v684_v38  ;;  %v687_v50 = vadd.f32 %v1756_v18, %v686_v46  ;;  %989 = vrot.lane.b32.xlu1 %v1792_v41, %s1639_s19  ;;  %841 = vst.msk [vmem:[%s1766_s17 + $0x38] sm:$0xf] %vm826_vm1, %v1462_v40  ;;  %v1463_v51 = vpack.c.bf16 %v631_v43, %v631_v43 }
 0x106   : > { %1019 = vrot.lane.b32.xlu0 %v1774_v36, %s1639_s19  ;;  %857 = vst.msk [vmem:[%s1766_s17 + $0x78] sm:$0xf] %vm826_vm1, %v1924_v35  ;;  %v1942_v52 = vpack.c.bf16 %v695_v45, %v695_v45  ;;  %839 = vst.msk [vmem:[%s1766_s17 + $0x30] sm:$0xf] %vm826_vm1, %v1927_v47  ;;  %v1461_v54 = vpack.c.bf16 %v623_v48, %v623_v48 }
 0x107   : > { %855 = vst.msk [vmem:[%s1766_s17 + $0x70] sm:$0xf] %vm826_vm1, %v1930_v49  ;;  %v1477_v18 = vpack.c.bf16 %v687_v50, %v687_v50  ;;  %842 = vst.msk [vmem:[%s1766_s17 + $0x3c] sm:$0xf] %vm826_vm1, %v1463_v51 }
 0x108   : > { %858 = vst.msk [vmem:[%s1766_s17 + $0x7c] sm:$0xf] %vm826_vm1, %v1942_v52  ;;  %840 = vst.msk [vmem:[%s1766_s17 + $0x34] sm:$0xf] %vm826_vm1, %v1461_v54 }
 0x109   : > { %856 = vst.msk [vmem:[%s1766_s17 + $0x74] sm:$0xf] %vm826_vm1, %v1477_v18  ;;  %1021 = vrot.lane.b32.xlu1 %v1794_v42, %s1639_s19 }
 0x10a   : > { %861 = vrot.lane.b32.xlu0 %v1792_v41, %s1638_s18 }
 0x10d   : > { %873 = vrot.lane.b32.xlu1 %v1831_v63, %s1638_s18 }
 0x10e   : > { %871 = vrot.lane.b32.xlu0 %v1813_v53, %s1638_s18 }
 0x111   : > { %905 = vrot.lane.b32.xlu1 %v1836_v0, %s1638_s18 }
 0x112   : > { %903 = vrot.lane.b32.xlu0 %v1816_v56, %s1638_s18 }
 0x115   : > { %1001 = vrot.lane.b32.xlu1 %v1831_v63, %s1639_s19 }
 0x116   : > { %999 = vrot.lane.b32.xlu0 %v1813_v53, %s1639_s19 }
 0x119   : > { %1033 = vrot.lane.b32.xlu1 %v1836_v0, %s1639_s19 }
 0x11a   : > { %1031 = vrot.lane.b32.xlu0 %v1816_v56, %s1639_s19 }
 0x11d   : > { %869 = vrot.lane.b32.xlu1 %v1841_v1, %s1638_s18 }
 0x11e   : > { %867 = vrot.lane.b32.xlu0 %v1819_v59, %s1638_s18 }
 0x121   : > { %901 = vrot.lane.b32.xlu1 %v1846_v2, %s1638_s18 }
 0x122   : > { %899 = vrot.lane.b32.xlu0 %v1822_v61, %s1638_s18 }
 0x125   : > { %997 = vrot.lane.b32.xlu1 %v1841_v1, %s1639_s19 }
 0x126   : > { %995 = vrot.lane.b32.xlu0 %v1819_v59, %s1639_s19 }
 0x129   : > { %1029 = vrot.lane.b32.xlu1 %v1846_v2, %s1639_s19 }
 0x12a   : > { %1027 = vrot.lane.b32.xlu0 %v1822_v61, %s1639_s19 }
 0x12d   : > { %881 = vrot.lane.b32.xlu1 %v1886_v24, %s1638_s18 }
 0x12e   : > { %879 = vrot.lane.b32.xlu0 %v1867_v13, %s1638_s18 }
 0x131   : > { %913 = vrot.lane.b32.xlu1 %v1891_v25, %s1638_s18 }
 0x132   : > { %911 = vrot.lane.b32.xlu0 %v1870_v16, %s1638_s18 }
 0x135   : > { %1009 = vrot.lane.b32.xlu1 %v1886_v24, %s1639_s19 }
 0x136   : > { %1007 = vrot.lane.b32.xlu0 %v1867_v13, %s1639_s19 }
 0x139   : > { %1041 = vrot.lane.b32.xlu1 %v1891_v25, %s1639_s19 }
 0x13a   : > { %1039 = vrot.lane.b32.xlu0 %v1870_v16, %s1639_s19 }
 0x13d   : > { %877 = vrot.lane.b32.xlu1 %v1896_v26, %s1638_s18 }
 0x13e   : > { %875 = vrot.lane.b32.xlu0 %v1873_v20, %s1638_s18 }
 0x141   : > { %909 = vrot.lane.b32.xlu1 %v1901_v27, %s1638_s18 }
 0x142   : > { %907 = vrot.lane.b32.xlu0 %v1876_v22, %s1638_s18 }
 0x145   : > { %1005 = vrot.lane.b32.xlu1 %v1896_v26, %s1639_s19 }
 0x146   : > { %1003 = vrot.lane.b32.xlu0 %v1873_v20, %s1639_s19 }
 0x149   : > { %1037 = vrot.lane.b32.xlu1 %v1901_v27, %s1639_s19 }
 0x14a   : > { %1035 = vrot.lane.b32.xlu0 %v1876_v22, %s1639_s19 }
 0x14d   : > { %889 = vrot.lane.b32.xlu1 %v1463_v51, %s1638_s18 }
 0x14e   : > { %887 = vrot.lane.b32.xlu0 %v1462_v40, %s1638_s18 }
 0x151   : > { %921 = vrot.lane.b32.xlu1 %v1942_v52, %s1638_s18 }
 0x152   : > { %919 = vrot.lane.b32.xlu0 %v1924_v35, %s1638_s18 }
 0x155   : > { %1017 = vrot.lane.b32.xlu1 %v1463_v51, %s1639_s19 }
 0x156   : > { %1015 = vrot.lane.b32.xlu0 %v1462_v40, %s1639_s19 }
 0x159   : > { %885 = vrot.lane.b32.xlu1 %v1461_v54, %s1638_s18 }
 0x15a   : > { %883 = vrot.lane.b32.xlu0 %v1927_v47, %s1638_s18 }
 0x15d   : > { %917 = vrot.lane.b32.xlu1 %v1477_v18, %s1638_s18 }
 0x15e   : > { %915 = vrot.lane.b32.xlu0 %v1930_v49, %s1638_s18 }
 0x15f   : > { %v864_v41 = vpop.permute.xlu1 %863 }
 0x160   : > { %v896_v36 = vpop.permute.xlu0 %895  ;;  %957 = vst.msk [vmem:[%s2045_s27 + $0x8] sm:$0xf] %vm826_vm1, %v864_v41 }
 0x161   : > { %973 = vst.msk [vmem:[%s2045_s27 + $0x48] sm:$0xf] %vm826_vm1, %v896_v36  ;;  %1013 = vrot.lane.b32.xlu1 %v1461_v54, %s1639_s19 }
 0x162   : > { %1011 = vrot.lane.b32.xlu0 %v1927_v47, %s1639_s19 }
 0x163   : > { %v866_v53 = vpop.permute.xlu1 %865 }
 0x164   : > { %v992_v42 = vpop.permute.xlu0 %991  ;;  %958 = vst.msk [vmem:[%s2045_s27 + $0xc] sm:$0xf] %vm826_vm1, %v866_v53 }
 0x165   : > { %1085 = vst.msk [vmem:[%s2058_s30 + $0x8] sm:$0xf] %vm826_vm1, %v992_v42  ;;  %1045 = vrot.lane.b32.xlu1 %v1477_v18, %s1639_s19 }
 0x166   : > { %1043 = vrot.lane.b32.xlu0 %v1930_v49, %s1639_s19 }
 0x167   : > { %v898_v56 = vpop.permute.xlu1 %897 }
 0x168   : > { %v1024_v55 = vpop.permute.xlu0 %1023  ;;  %974 = vst.msk [vmem:[%s2045_s27 + $0x4c] sm:$0xf] %vm826_vm1, %v898_v56 }
 0x169   : > { %1101 = vst.msk [vmem:[%s2058_s30 + $0x48] sm:$0xf] %vm826_vm1, %v1024_v55  ;;  %1049 = vrot.lane.b32.xlu1 %v1942_v52, %s1639_s19 }
 0x16a   : > { %1047 = vrot.lane.b32.xlu0 %v1924_v35, %s1639_s19 }
 0x16b   : > { %v994_v57 = vpop.permute.xlu1 %993 }
 0x16c   : > { %v860_v58 = vpop.permute.xlu0 %859  ;;  %1086 = vst.msk [vmem:[%s2058_s30 + $0xc] sm:$0xf] %vm826_vm1, %v994_v57 }
 0x16d   : > { %955 = vst.msk [vmem:[%s2045_s27] sm:$0xf] %vm826_vm1, %v860_v58 }
 0x16f   : > { %v1026_v59 = vpop.permute.xlu1 %1025 }
 0x170   : > { %v892_v60 = vpop.permute.xlu0 %891  ;;  %1102 = vst.msk [vmem:[%s2058_s30 + $0x4c] sm:$0xf] %vm826_vm1, %v1026_v59 }
 0x171   : > { %971 = vst.msk [vmem:[%s2045_s27 + $0x40] sm:$0xf] %vm826_vm1, %v892_v60 }
 0x173   : > { %v894_v61 = vpop.permute.xlu1 %893 }
 0x174   : > { %v988_v62 = vpop.permute.xlu0 %987  ;;  %972 = vst.msk [vmem:[%s2045_s27 + $0x44] sm:$0xf] %vm826_vm1, %v894_v61 }
 0x175   : > { %1083 = vst.msk [vmem:[%s2058_s30] sm:$0xf] %vm826_vm1, %v988_v62 }
 0x177   : > { %v990_v63 = vpop.permute.xlu1 %989 }
 0x178   : > { %v1020_v0 = vpop.permute.xlu0 %1019  ;;  %1084 = vst.msk [vmem:[%s2058_s30 + $0x4] sm:$0xf] %vm826_vm1, %v990_v63 }
 0x179   : > { %1099 = vst.msk [vmem:[%s2058_s30 + $0x40] sm:$0xf] %vm826_vm1, %v1020_v0 }
 0x17b   : > { %v1022_v1 = vpop.permute.xlu1 %1021 }
 0x17c   : > { %v862_v2 = vpop.permute.xlu0 %861  ;;  %1100 = vst.msk [vmem:[%s2058_s30 + $0x44] sm:$0xf] %vm826_vm1, %v1022_v1 }
 0x17d   : > { %956 = vst.msk [vmem:[%s2045_s27 + $0x4] sm:$0xf] %vm826_vm1, %v862_v2 }
 0x17f   : > { %v874_v3 = vpop.permute.xlu1 %873 }
 0x180   : > { %v872_v4 = vpop.permute.xlu0 %871  ;;  %962 = vst.msk [vmem:[%s2045_s27 + $0x1c] sm:$0xf] %vm826_vm1, %v874_v3 }
 0x181   : > { %961 = vst.msk [vmem:[%s2045_s27 + $0x18] sm:$0xf] %vm826_vm1, %v872_v4 }
 0x183   : > { %v906_v5 = vpop.permute.xlu1 %905 }
 0x184   : > { %v904_v6 = vpop.permute.xlu0 %903  ;;  %978 = vst.msk [vmem:[%s2045_s27 + $0x5c] sm:$0xf] %vm826_vm1, %v906_v5 }
 0x185   : > { %977 = vst.msk [vmem:[%s2045_s27 + $0x58] sm:$0xf] %vm826_vm1, %v904_v6 }
 0x187   : > { %v1002_v7 = vpop.permute.xlu1 %1001 }
 0x188   : > { %v1000_v8 = vpop.permute.xlu0 %999  ;;  %1090 = vst.msk [vmem:[%s2058_s30 + $0x1c] sm:$0xf] %vm826_vm1, %v1002_v7 }
 0x189   : > { %1089 = vst.msk [vmem:[%s2058_s30 + $0x18] sm:$0xf] %vm826_vm1, %v1000_v8 }
 0x18b   : > { %v1034_v9 = vpop.permute.xlu1 %1033 }
 0x18c   : > { %v1032_v10 = vpop.permute.xlu0 %1031  ;;  %1106 = vst.msk [vmem:[%s2058_s30 + $0x5c] sm:$0xf] %vm826_vm1, %v1034_v9 }
 0x18d   : > { %1105 = vst.msk [vmem:[%s2058_s30 + $0x58] sm:$0xf] %vm826_vm1, %v1032_v10 }
 0x18f   : > { %v870_v11 = vpop.permute.xlu1 %869 }
 0x190   : > { %v868_v12 = vpop.permute.xlu0 %867  ;;  %960 = vst.msk [vmem:[%s2045_s27 + $0x14] sm:$0xf] %vm826_vm1, %v870_v11 }
 0x191   : > { %959 = vst.msk [vmem:[%s2045_s27 + $0x10] sm:$0xf] %vm826_vm1, %v868_v12 }
 0x193   : > { %v902_v13 = vpop.permute.xlu1 %901 }
 0x194   : > { %v900_v14 = vpop.permute.xlu0 %899  ;;  %976 = vst.msk [vmem:[%s2045_s27 + $0x54] sm:$0xf] %vm826_vm1, %v902_v13 }
 0x195   : > { %975 = vst.msk [vmem:[%s2045_s27 + $0x50] sm:$0xf] %vm826_vm1, %v900_v14 }
 0x197   : > { %v998_v15 = vpop.permute.xlu1 %997 }
 0x198   : > { %v996_v16 = vpop.permute.xlu0 %995  ;;  %1088 = vst.msk [vmem:[%s2058_s30 + $0x14] sm:$0xf] %vm826_vm1, %v998_v15 }
 0x199   : > { %1087 = vst.msk [vmem:[%s2058_s30 + $0x10] sm:$0xf] %vm826_vm1, %v996_v16 }
 0x19b   : > { %v1030_v17 = vpop.permute.xlu1 %1029 }
 0x19c   : > { %v1028_v19 = vpop.permute.xlu0 %1027  ;;  %1104 = vst.msk [vmem:[%s2058_s30 + $0x54] sm:$0xf] %vm826_vm1, %v1030_v17 }
 0x19d   : > { %1103 = vst.msk [vmem:[%s2058_s30 + $0x50] sm:$0xf] %vm826_vm1, %v1028_v19 }
 0x19f   : > { %v882_v20 = vpop.permute.xlu1 %881 }
 0x1a0   : > { %v880_v21 = vpop.permute.xlu0 %879  ;;  %966 = vst.msk [vmem:[%s2045_s27 + $0x2c] sm:$0xf] %vm826_vm1, %v882_v20 }
 0x1a1   : > { %965 = vst.msk [vmem:[%s2045_s27 + $0x28] sm:$0xf] %vm826_vm1, %v880_v21 }
 0x1a3   : > { %v914_v22 = vpop.permute.xlu1 %913 }
 0x1a4   : > { %v912_v23 = vpop.permute.xlu0 %911  ;;  %982 = vst.msk [vmem:[%s2045_s27 + $0x6c] sm:$0xf] %vm826_vm1, %v914_v22 }
 0x1a5   : > { %981 = vst.msk [vmem:[%s2045_s27 + $0x68] sm:$0xf] %vm826_vm1, %v912_v23 }
 0x1a7   : > { %v1010_v24 = vpop.permute.xlu1 %1009 }
 0x1a8   : > { %v1008_v25 = vpop.permute.xlu0 %1007  ;;  %1094 = vst.msk [vmem:[%s2058_s30 + $0x2c] sm:$0xf] %vm826_vm1, %v1010_v24 }
 0x1a9   : > { %1093 = vst.msk [vmem:[%s2058_s30 + $0x28] sm:$0xf] %vm826_vm1, %v1008_v25 }
 0x1ab   : > { %v1042_v26 = vpop.permute.xlu1 %1041 }
 0x1ac   : > { %v1040_v27 = vpop.permute.xlu0 %1039  ;;  %1110 = vst.msk [vmem:[%s2058_s30 + $0x6c] sm:$0xf] %vm826_vm1, %v1042_v26 }
 0x1ad   : > { %1109 = vst.msk [vmem:[%s2058_s30 + $0x68] sm:$0xf] %vm826_vm1, %v1040_v27 }
 0x1af   : > { %v878_v28 = vpop.permute.xlu1 %877 }
 0x1b0   : > { %v876_v29 = vpop.permute.xlu0 %875  ;;  %964 = vst.msk [vmem:[%s2045_s27 + $0x24] sm:$0xf] %vm826_vm1, %v878_v28 }
 0x1b1   : > { %963 = vst.msk [vmem:[%s2045_s27 + $0x20] sm:$0xf] %vm826_vm1, %v876_v29 }
 0x1b3   : > { %v910_v30 = vpop.permute.xlu1 %909 }
 0x1b4   : > { %v908_v31 = vpop.permute.xlu0 %907  ;;  %980 = vst.msk [vmem:[%s2045_s27 + $0x64] sm:$0xf] %vm826_vm1, %v910_v30 }
 0x1b5   : > { %979 = vst.msk [vmem:[%s2045_s27 + $0x60] sm:$0xf] %vm826_vm1, %v908_v31 }
 0x1b7   : > { %v1006_v32 = vpop.permute.xlu1 %1005 }
 0x1b8   : > { %v1004_v33 = vpop.permute.xlu0 %1003  ;;  %1092 = vst.msk [vmem:[%s2058_s30 + $0x24] sm:$0xf] %vm826_vm1, %v1006_v32 }
 0x1b9   : > { %1091 = vst.msk [vmem:[%s2058_s30 + $0x20] sm:$0xf] %vm826_vm1, %v1004_v33 }
 0x1bb   : > { %v1038_v34 = vpop.permute.xlu1 %1037 }
 0x1bc   : > { %v1036_v37 = vpop.permute.xlu0 %1035  ;;  %1108 = vst.msk [vmem:[%s2058_s30 + $0x64] sm:$0xf] %vm826_vm1, %v1038_v34 }
 0x1bd   : > { %1107 = vst.msk [vmem:[%s2058_s30 + $0x60] sm:$0xf] %vm826_vm1, %v1036_v37 }
 0x1bf   : > { %v890_v38 = vpop.permute.xlu1 %889 }
 0x1c0   : > { %v888_v39 = vpop.permute.xlu0 %887  ;;  %970 = vst.msk [vmem:[%s2045_s27 + $0x3c] sm:$0xf] %vm826_vm1, %v890_v38 }
 0x1c1   : > { %969 = vst.msk [vmem:[%s2045_s27 + $0x38] sm:$0xf] %vm826_vm1, %v888_v39 }
 0x1c3   : > { %v922_v40 = vpop.permute.xlu1 %921 }
 0x1c4   : > { %v920_v43 = vpop.permute.xlu0 %919  ;;  %986 = vst.msk [vmem:[%s2045_s27 + $0x7c] sm:$0xf] %vm826_vm1, %v922_v40 }
 0x1c5   : > { %985 = vst.msk [vmem:[%s2045_s27 + $0x78] sm:$0xf] %vm826_vm1, %v920_v43 }
 0x1c7   : > { %v1018_v44 = vpop.permute.xlu1 %1017 }
 0x1c8   : > { %v1016_v35 = vpop.permute.xlu0 %1015  ;;  %1098 = vst.msk [vmem:[%s2058_s30 + $0x3c] sm:$0xf] %vm826_vm1, %v1018_v44 }
 0x1c9   : > { %1097 = vst.msk [vmem:[%s2058_s30 + $0x38] sm:$0xf] %vm826_vm1, %v1016_v35 }
 0x1cb   : > { %v886_v45 = vpop.permute.xlu1 %885 }
 0x1cc   : > { %v884_v46 = vpop.permute.xlu0 %883  ;;  %968 = vst.msk [vmem:[%s2045_s27 + $0x34] sm:$0xf] %vm826_vm1, %v886_v45 }
 0x1cd   : > { %967 = vst.msk [vmem:[%s2045_s27 + $0x30] sm:$0xf] %vm826_vm1, %v884_v46 }
 0x1cf   : > { %v918_v47 = vpop.permute.xlu1 %917 }
 0x1d0   : > { %v916_v48 = vpop.permute.xlu0 %915  ;;  %984 = vst.msk [vmem:[%s2045_s27 + $0x74] sm:$0xf] %vm826_vm1, %v918_v47 }
 0x1d1   : > { %983 = vst.msk [vmem:[%s2045_s27 + $0x70] sm:$0xf] %vm826_vm1, %v916_v48 }
 0x1d3   : > { %v1014_v49 = vpop.permute.xlu1 %1013 }
 0x1d4   : > { %v1012_v50 = vpop.permute.xlu0 %1011  ;;  %1096 = vst.msk [vmem:[%s2058_s30 + $0x34] sm:$0xf] %vm826_vm1, %v1014_v49 }
 0x1d5   : > { %1095 = vst.msk [vmem:[%s2058_s30 + $0x30] sm:$0xf] %vm826_vm1, %v1012_v50 }
 0x1d7   : > { %v1046_v51 = vpop.permute.xlu1 %1045 }
 0x1d8   : > { %v1044_v52 = vpop.permute.xlu0 %1043  ;;  %1112 = vst.msk [vmem:[%s2058_s30 + $0x74] sm:$0xf] %vm826_vm1, %v1046_v51 }
 0x1d9   : > { %1111 = vst.msk [vmem:[%s2058_s30 + $0x70] sm:$0xf] %vm826_vm1, %v1044_v52 }
 0x1db   : > { %v1050_v54 = vpop.permute.xlu1 %1049 }
 0x1dc   : > { %v1048_v18 = vpop.permute.xlu0 %1047  ;;  %1114 = vst.msk [vmem:[%s2058_s30 + $0x7c] sm:$0xf] %vm826_vm1, %v1050_v54 }
 0x1dd   : > { %1113 = vst.msk [vmem:[%s2058_s30 + $0x78] sm:$0xf] %vm826_vm1, %v1048_v18 }
 0x1de PF: > { %s16_s22 = sadd.s32 1, %s1636_s22   ;;  %s2212_s18 = smov %s1628_s20 }
 0x1df   : > { %p13_p7 = scmp.ge.s32.totalorder %s16_s22, 10   ;;  %s2213_s19 = smov %s1632_s21 }
 0x1e0   : > { %s2214_s20 = smov %s2217_s23  ;;  %s2215_s21 = smov %s2221_s24 }
 0x1e1   :  { %15 = sbr.rel (!%p13_p7) target bundleno = 3 (0x3), region = 88 }

// kernel: _lambda_.4
= control target key start
LH: loop header
LB: loop body
LE: loop exit
PB: predicated region body
PF: predicated region fallthrough
CT: control target
= control target key end

     0   :  { %s2610_s15 = smov 0   ;;  %s2612_s16 = smov 0   ;;  %s3168_s0 = inlined_call_operand.vmem [shape: bf16[2,4,256,8], index: 0, kind: input, shape index: {}]   ;;  %s3169_s1 = inlined_call_operand.vmem [shape: bf16[2,4,256,8], index: 1, kind: input, shape index: {}]   ;;  %s3170_s2 = inlined_call_operand.vmem [shape: bf16[2,4,256,8], index: 2, kind: input, shape index: {}]   ;;  %s3171_s3 = inlined_call_operand.vmem [shape: f32[1,256], index: 3, kind: input, shape index: {}]   ;;  %s3172_s4 = inlined_call_operand.vmem [shape: bf16[2,4,256,8], index: 4, kind: output, shape index: {}]  }
   0x1   :  { %s2614_s17 = smov 0   ;;  %s2616_s18 = smov 0  }
   0x2   :  { %s2618_s19 = smov 0  }
   0x3 LB: > { %s29_s20 = sadd.s32 1, %s2575_s17  ;;  %s33_s21 = sadd.s32 1, %s2579_s18  ;;  %s2583_s19 = sphi %s2618_s19, %s14_s19   ;;  %s2579_s18 = sphi %s2616_s18, %s3215_s18   ;;  %s2575_s17 = sphi %s2614_s17, %s3214_s17   ;;  %s2571_s16 = sphi %s2612_s16, %s3213_s16   ;;  %s2567_s15 = sphi %s2610_s15, %s3212_s15  }
   0x4   : > { %p31_p0 = scmp.ge.s32.totalorder %s29_s20, 4  ;;  %p1954_p1 = scmp.ge.s32.totalorder %s2583_s19, 1 }
   0x5   : > { %p230_p2 = scmp.lt.s32.totalorder %s2583_s19, 9 }
   0x6   : > { %s3217_s20 = smov (%p31_p0, %s29_s20), 0  ;;  %s3219_s21 = smov (!%p31_p0, %s33_s21), %s2579_s18 }
   0x7   : > { %p231_p3 = pnand %p1954_p1, %p230_p2  ;;  %p35_p4 = scmp.ge.s32.totalorder %s3219_s21, 2 }
   0x9   : > { %s3221_s21 = smov (%p35_p4, %s3219_s21), 0  ;;  %234 = sbr.rel (%p231_p3) target bundleno = 813 (0x32d), region = 36 }
  0x10   : > { %p291_p5 = scmp.lt.s32.totalorder %s2571_s16, 1  ;;  %p293_p6 = scmp.lt.s32.totalorder %s2567_s15, 3  ;;  %vm605_vm0 = vcmask 64512   ;;  %v435_v40 = vlaneseq  ;;  %v433_v43 = vld [vmem:[%s3171_s3] sm:$0x3]  ;;  %vm1760_vm1 = vcmask 60416  }
  0x12   : > { %s3223_s16 = smov (!%p291_p5, %s2571_s16), 1  ;;  %s3225_s15 = smov (!%p293_p6, %s2567_s15), 3  ;;  %v436_v41 = vshrl.u32 %v435_v40, 7 }
  0x13   : > { %s1956_s22 = sshll.u32 %s3223_s16, 7  ;;  %s1955_s23 = sshll.u32 %s3225_s15, 5 }
  0x14   : > { %s300_s24 = sadd.s32 %s1956_s22, %s1955_s23  ;;  %v437_v42 = vsub.s32 0, %v436_v41  ;;  %v441_v44 = vsub.s32 1, %v436_v41 }
  0x15   : > { %s2640_s25 = sshll.u32 %s300_s24, 2 }
  0x16   : > { %s2646_s28 = scalar_lea.vmem %s3169_s1, %s2640_s25  ;;  %s2663_s5 = scalar_lea.vmem %s3168_s0, %s2640_s25  ;;  %v2737_v45 = vrot.slane %v433_v43, %v437_v42  ;;  %v2739_v46 = vrot.slane %v433_v43, %v441_v44 }
  0x17   : > { %v2305_v0 = vld [vmem:[%s2646_s28 + $0x40] sm:$0xff]   ;;  %v2307_v2 = vld [vmem:[%s2646_s28 + $0x48] sm:$0xff]   ;;  %v2309_v6 = vld [vmem:[%s2646_s28 + $0x50] sm:$0xff]   ;;  %s2745_s10 = scalar_lea.vmem %s3170_s2, %s2640_s25  ;;  %s3087_s13 = scalar_lea.vmem %s3172_s4, %s2640_s25 }
  0x18   : > { %v2306_v1 = vld [vmem:[%s2646_s28] sm:$0xff]   ;;  %2257 = vmatprep.subr.msk.bf16.mxu0 %vm605_vm0, %v2305_v0  ;;  %v2308_v4 = vld [vmem:[%s2646_s28 + $0x8] sm:$0xff]   ;;  %v2310_v7 = vld [vmem:[%s2646_s28 + $0x10] sm:$0xff]  }
  0x19   : > { %v655_v3 = vsel %vm605_vm0, %v2306_v1, 0  ;;  %v658_v5 = vsel %vm605_vm0, %v2308_v4, 0  ;;  %v2321_v8 = vld [vmem:[%s2663_s5] sm:$0xff]   ;;  %v661_v9 = vsel %vm605_vm0, %v2310_v7, 0  ;;  %v2311_v10 = vld [vmem:[%s2646_s28 + $0x58] sm:$0xff]   ;;  %v2315_v16 = vld [vmem:[%s2646_s28 + $0x68] sm:$0xff]  }
  0x1a   : > { %2098 = vmatpush3.bf16.xpose.msra.mxu0 %v655_v3  ;;  %2113 = vmatprep.mubr.msk.bf16.mxu0 %vm605_vm0, %v2321_v8  ;;  %v2312_v11 = vld [vmem:[%s2646_s28 + $0x18] sm:$0xff]   ;;  %v2313_v13 = vld [vmem:[%s2646_s28 + $0x60] sm:$0xff]   ;;  %v2316_v17 = vld [vmem:[%s2646_s28 + $0x28] sm:$0xff]  }
  0x1b   : > { %2258 = vmatprep.subr.msk.bf16.mxu0 %vm605_vm0, %v2307_v2  ;;  %v664_v12 = vsel %vm605_vm0, %v2312_v11, 0  ;;  %v2314_v14 = vld [vmem:[%s2646_s28 + $0x20] sm:$0xff]   ;;  %v670_v18 = vsel %vm605_vm0, %v2316_v17, 0  ;;  %v2317_v19 = vld [vmem:[%s2646_s28 + $0x70] sm:$0xff]   ;;  %v2319_v22 = vld [vmem:[%s2646_s28 + $0x78] sm:$0xff]  }
  0x1c   : > { %v667_v15 = vsel %vm605_vm0, %v2314_v14, 0  ;;  %v2318_v20 = vld [vmem:[%s2646_s28 + $0x30] sm:$0xff]   ;;  %v2320_v23 = vld [vmem:[%s2646_s28 + $0x38] sm:$0xff]   ;;  %v2322_v25 = vld [vmem:[%s2663_s5 + $0x8] sm:$0xff]  }
  0x1d   : > { %v673_v21 = vsel %vm605_vm0, %v2318_v20, 0  ;;  %v676_v24 = vsel %vm605_vm0, %v2320_v23, 0  ;;  %v2323_v26 = vld [vmem:[%s2663_s5 + $0x10] sm:$0xff]   ;;  %v2324_v27 = vld [vmem:[%s2663_s5 + $0x18] sm:$0xff]   ;;  %v2325_v28 = vld [vmem:[%s2663_s5 + $0x20] sm:$0xff]  }
  0x1e   : > { %v2326_v29 = vld [vmem:[%s2663_s5 + $0x28] sm:$0xff]   ;;  %v2327_v30 = vld [vmem:[%s2663_s5 + $0x30] sm:$0xff]   ;;  %v2328_v31 = vld [vmem:[%s2663_s5 + $0x38] sm:$0xff]  }
  0x1f   : > { %v2329_v32 = vld [vmem:[%s2663_s5 + $0x40] sm:$0xff]   ;;  %v2330_v33 = vld [vmem:[%s2663_s5 + $0x48] sm:$0xff]   ;;  %v2331_v34 = vld [vmem:[%s2663_s5 + $0x50] sm:$0xff]  }
  0x20   : > { %v2332_v35 = vld [vmem:[%s2663_s5 + $0x58] sm:$0xff]   ;;  %v2333_v36 = vld [vmem:[%s2663_s5 + $0x60] sm:$0xff]   ;;  %v2334_v37 = vld [vmem:[%s2663_s5 + $0x68] sm:$0xff]  }
  0x21   : > { %v2335_v38 = vld [vmem:[%s2663_s5 + $0x70] sm:$0xff]   ;;  %v2336_v39 = vld [vmem:[%s2663_s5 + $0x78] sm:$0xff]   ;;  %v2337_v50 = vld [vmem:[%s2745_s10 + $0x40] sm:$0xff]  }
  0x22   : > { %2100 = vmatpush3.bf16.xpose.msra.mxu0 %v658_v5  ;;  %v2338_v53 = vld [vmem:[%s2745_s10] sm:$0xff]   ;;  %2145 = vmatprep.subr.bf16.mxu1 %v2337_v50  ;;  %v2339_v55 = vld [vmem:[%s2745_s10 + $0x48] sm:$0xff]   ;;  %v2341_v60 = vld [vmem:[%s2745_s10 + $0x50] sm:$0xff]  }
  0x23   : > { %2259 = vmatprep.subr.msk.bf16.mxu0 %vm605_vm0, %v2309_v6  ;;  %2146 = vmatpush3.bf16.msra.mxu1 %v2338_v53  ;;  %v2340_v59 = vld [vmem:[%s2745_s10 + $0x8] sm:$0xff]   ;;  %v2342_v63 = vld [vmem:[%s2745_s10 + $0x10] sm:$0xff]   ;;  %v2344_v20 = vld [vmem:[%s2745_s10 + $0x18] sm:$0xff]  }
  0x24   : > { %2147 = vmatprep.subr.bf16.mxu1 %v2339_v55  ;;  %v2350_v41 = vld [vmem:[%s2745_s10 + $0x30] sm:$0xff]  }
  0x27   : > { %2148 = vmatpush3.bf16.msra.mxu1 %v2340_v59 }
  0x28   : > { %2149 = vmatprep.subr.bf16.mxu1 %v2341_v60 }
  0x2a   : > { %2102 = vmatpush3.bf16.xpose.msra.mxu0 %v661_v9 }
  0x2b   : > { %2260 = vmatprep.subr.msk.bf16.mxu0 %vm605_vm0, %v2311_v10  ;;  %2150 = vmatpush3.bf16.msra.mxu1 %v2342_v63 }
  0x32   : > { %2104 = vmatpush3.bf16.xpose.msra.mxu0 %v664_v12 }
  0x33   : > { %2261 = vmatprep.subr.msk.bf16.mxu0 %vm605_vm0, %v2313_v13 }
  0x3a   : > { %2106 = vmatpush3.bf16.xpose.msra.mxu0 %v667_v15 }
  0x3b   : > { %2262 = vmatprep.subr.msk.bf16.mxu0 %vm605_vm0, %v2315_v16 }
  0x42   : > { %2108 = vmatpush3.bf16.xpose.msra.mxu0 %v670_v18  ;;  %v2343_v18 = vld [vmem:[%s2745_s10 + $0x58] sm:$0xff]  }
  0x43   : > { %2263 = vmatprep.subr.msk.bf16.mxu0 %vm605_vm0, %v2317_v19  ;;  %2151 = vmatprep.subr.bf16.mxu1 %v2343_v18 }
  0x44   : > { %2152 = vmatpush3.bf16.msra.mxu1 %v2344_v20 }
  0x4a   : > { %2110 = vmatpush3.bf16.xpose.msra.mxu0 %v673_v21 }
  0x4b   : > { %2264 = vmatprep.subr.msk.bf16.mxu0 %vm605_vm0, %v2319_v22 }
  0x52   : > { %2112 = vmatpush3.bf16.xpose.msra.mxu0 %v676_v24  ;;  %v2345_v24 = vld [vmem:[%s2745_s10 + $0x60] sm:$0xff]  }
  0x53   : > { %2153 = vmatprep.subr.bf16.mxu1 %v2345_v24 }
  0x59   : > { %2114 = vmatmul.mubr.msk.bf16.vlgmr.msra.gmra.mrb[0].mxu0 %vm605_vm0, %v2321_v8 }
  0x5a   : > { %2115 = vmatprep.mubr.msk.bf16.mxu0 %vm605_vm0, %v2322_v25 }
  0x61   : > { %2116 = vmatmul.mubr.msk.bf16.gmra.mrb[4].mxu0 %vm605_vm0, %v2322_v25 }
  0x62   : > { %2117 = vmatprep.mubr.msk.bf16.mxu0 %vm605_vm0, %v2323_v26 }
  0x69   : > { %2118 = vmatmul.mubr.msk.bf16.gmra.mrb[8].mxu0 %vm605_vm0, %v2323_v26 }
  0x6a   : > { %2119 = vmatprep.mubr.msk.bf16.mxu0 %vm605_vm0, %v2324_v27 }
  0x71   : > { %2120 = vmatmul.mubr.msk.bf16.gmra.mrb[12].mxu0 %vm605_vm0, %v2324_v27  ;;  %v2346_v27 = vld [vmem:[%s2745_s10 + $0x20] sm:$0xff]  }
  0x72   : > { %2121 = vmatprep.mubr.msk.bf16.mxu0 %vm605_vm0, %v2325_v28  ;;  %2154 = vmatpush3.bf16.msra.mxu1 %v2346_v27 }
  0x79   : > { %2122 = vmatmul.mubr.msk.bf16.gmra.mrb[16].mxu0 %vm605_vm0, %v2325_v28 }
  0x7a   : > { %2123 = vmatprep.mubr.msk.bf16.mxu0 %vm605_vm0, %v2326_v29 }
  0x81   : > { %2124 = vmatmul.mubr.msk.bf16.gmra.mrb[20].mxu0 %vm605_vm0, %v2326_v29 }
  0x82   : > { %2125 = vmatprep.mubr.msk.bf16.mxu0 %vm605_vm0, %v2327_v30 }
  0x89   : > { %2126 = vmatmul.mubr.msk.bf16.gmra.mrb[24].mxu0 %vm605_vm0, %v2327_v30 }
  0x8a   : > { %2127 = vmatprep.mubr.msk.bf16.mxu0 %vm605_vm0, %v2328_v31 }
  0x91   : > { %2128 = vmatmul.mubr.msk.bf16.gmra.mrb[28].mxu0 %vm605_vm0, %v2328_v31 }
  0x92   : > { %2129 = vmatprep.mubr.msk.bf16.mxu0 %vm605_vm0, %v2329_v32 }
  0x99   : > { %2130 = vmatmul.mubr.msk.bf16.gmra.mrb[32].mxu0 %vm605_vm0, %v2329_v32  ;;  %v2347_v32 = vld [vmem:[%s2745_s10 + $0x68] sm:$0xff]  }
  0x9a   : > { %2131 = vmatprep.mubr.msk.bf16.mxu0 %vm605_vm0, %v2330_v33  ;;  %2155 = vmatprep.subr.bf16.mxu1 %v2347_v32 }
  0xa1   : > { %2132 = vmatmul.mubr.msk.bf16.gmra.mrb[36].mxu0 %vm605_vm0, %v2330_v33 }
  0xa2   : > { %2133 = vmatprep.mubr.msk.bf16.mxu0 %vm605_vm0, %v2331_v34 }
  0xa9   : > { %2134 = vmatmul.mubr.msk.bf16.gmra.mrb[40].mxu0 %vm605_vm0, %v2331_v34  ;;  %v2348_v34 = vld [vmem:[%s2745_s10 + $0x28] sm:$0xff]  }
  0xaa   : > { %2135 = vmatprep.mubr.msk.bf16.mxu0 %vm605_vm0, %v2332_v35  ;;  %2156 = vmatpush3.bf16.msra.mxu1 %v2348_v34 }
  0xb1   : > { %2136 = vmatmul.mubr.msk.bf16.gmra.mrb[44].mxu0 %vm605_vm0, %v2332_v35 }
  0xb2   : > { %2137 = vmatprep.mubr.msk.bf16.mxu0 %vm605_vm0, %v2333_v36 }
  0xb9   : > { %2138 = vmatmul.mubr.msk.bf16.gmra.mrb[48].mxu0 %vm605_vm0, %v2333_v36 }
  0xba   : > { %2139 = vmatprep.mubr.msk.bf16.mxu0 %vm605_vm0, %v2334_v37 }
  0xc1   : > { %2140 = vmatmul.mubr.msk.bf16.gmra.mrb[52].mxu0 %vm605_vm0, %v2334_v37 }
  0xc2   : > { %2141 = vmatprep.mubr.msk.bf16.mxu0 %vm605_vm0, %v2335_v38 }
  0xc9   : > { %2142 = vmatmul.mubr.msk.bf16.gmra.mrb[56].mxu0 %vm605_vm0, %v2335_v38  ;;  %v2349_v38 = vld [vmem:[%s2745_s10 + $0x70] sm:$0xff]  }
  0xca   : > { %2143 = vmatprep.mubr.msk.bf16.mxu0 %vm605_vm0, %v2336_v39  ;;  %2157 = vmatprep.subr.bf16.mxu1 %v2349_v38 }
  0xcb   : > { %2158 = vmatpush3.bf16.msra.mxu1 %v2350_v41 }
  0xd1   : > { %2144 = vmatmul.mubr.msk.bf16.gmra.mrb[60].mxu0 %vm605_vm0, %v2336_v39 }
 0x12c   : > { %v736_v47 = vpop.f32.mrb[0].mxu0 }
 0x12d   : > { %v2748_v48 = vadd.f32 %v736_v47, %v2737_v45  ;;  %v738_v49 = vpop.f32.mrb[1].mxu0 }
 0x12e   : > { %v2752_v51 = vadd.f32 %v738_v49, %v2739_v46  ;;  %v740_v52 = vpop.f32.mrb[2].mxu0  ;;  %v2351_v49 = vld [vmem:[%s2745_s10 + $0x78] sm:$0xff]  }
 0x12f   : > { %v742_v54 = vpop.f32.mrb[3].mxu0  ;;  %v2757_v56 = vadd.f32 %v740_v52, %v2737_v45  ;;  %v2352_v52 = vld [vmem:[%s2745_s10 + $0x38] sm:$0xff]   ;;  %2159 = vmatprep.subr.bf16.mxu1 %v2351_v49 }
 0x130   : > { %v2760_v57 = vadd.f32 %v742_v54, %v2739_v46  ;;  %v895_v58 = vmax.f32 %v2748_v48, %v2752_v51  ;;  %2160 = vmatpush3.bf16.msra.mxu1 %v2352_v52 }
 0x132   : > { %896 = vmax.xlane.f32.xlu0 %v895_v58  ;;  %v898_v62 = vmax.f32 %v2757_v56, %v2760_v57 }
 0x134   : > { %v746_v61 = vpop.f32.mrb[4].mxu0 }
 0x135   : > { %v2770_v0 = vadd.f32 %v746_v61, %v2737_v45  ;;  %v748_v1 = vpop.f32.mrb[5].mxu0 }
 0x136   : > { %v2773_v2 = vadd.f32 %v748_v1, %v2739_v46  ;;  %v750_v3 = vpop.f32.mrb[6].mxu0  ;;  %899 = vmax.xlane.f32.xlu0 %v898_v62 }
 0x137   : > { %v752_v4 = vpop.f32.mrb[7].mxu0  ;;  %v2776_v5 = vadd.f32 %v750_v3, %v2737_v45 }
 0x138   : > { %v2779_v6 = vadd.f32 %v752_v4, %v2739_v46  ;;  %v901_v7 = vmax.f32 %v2770_v0, %v2773_v2 }
 0x13a   : > { %902 = vmax.xlane.f32.xlu1 %v901_v7  ;;  %v904_v9 = vmax.f32 %v2776_v5, %v2779_v6 }
 0x13c   : > { %v756_v8 = vpop.f32.mrb[8].mxu0 }
 0x13d   : > { %v2786_v10 = vadd.f32 %v756_v8, %v2737_v45  ;;  %v758_v11 = vpop.f32.mrb[9].mxu0 }
 0x13e   : > { %v2789_v12 = vadd.f32 %v758_v11, %v2739_v46  ;;  %v760_v13 = vpop.f32.mrb[10].mxu0  ;;  %905 = vmax.xlane.f32.xlu1 %v904_v9 }
 0x13f   : > { %v2792_v14 = vadd.f32 %v760_v13, %v2737_v45  ;;  %v762_v15 = vpop.f32.mrb[11].mxu0 }
 0x140   : > { %v2795_v16 = vadd.f32 %v762_v15, %v2739_v46  ;;  %v907_v17 = vmax.f32 %v2786_v10, %v2789_v12 }
 0x142   : > { %908 = vmax.xlane.f32.xlu0 %v907_v17  ;;  %v910_v19 = vmax.f32 %v2792_v14, %v2795_v16 }
 0x144   : > { %v766_v21 = vpop.f32.mrb[12].mxu0  ;;  %911 = vmax.xlane.f32.xlu1 %v910_v19 }
 0x145   : > { %v2804_v22 = vadd.f32 %v766_v21, %v2737_v45  ;;  %v768_v23 = vpop.f32.mrb[13].mxu0 }
 0x146   : > { %v2808_v25 = vadd.f32 %v768_v23, %v2739_v46  ;;  %v770_v26 = vpop.f32.mrb[14].mxu0 }
 0x147   : > { %v2812_v28 = vadd.f32 %v770_v26, %v2737_v45  ;;  %v772_v29 = vpop.f32.mrb[15].mxu0 }
 0x148   : > { %v2815_v30 = vadd.f32 %v772_v29, %v2739_v46  ;;  %v913_v31 = vmax.f32 %v2804_v22, %v2808_v25 }
 0x14a   : > { %914 = vmax.xlane.f32.xlu0 %v913_v31  ;;  %v916_v33 = vmax.f32 %v2812_v28, %v2815_v30 }
 0x14c   : > { %v776_v35 = vpop.f32.mrb[16].mxu0  ;;  %917 = vmax.xlane.f32.xlu1 %v916_v33 }
 0x14d   : > { %v2824_v36 = vadd.f32 %v776_v35, %v2737_v45  ;;  %v778_v37 = vpop.f32.mrb[17].mxu0 }
 0x14e   : > { %v2828_v39 = vadd.f32 %v778_v37, %v2739_v46  ;;  %v780_v40 = vpop.f32.mrb[18].mxu0 }
 0x14f   : > { %v2832_v42 = vadd.f32 %v780_v40, %v2737_v45  ;;  %v782_v43 = vpop.f32.mrb[19].mxu0 }
 0x150   : > { %v2835_v44 = vadd.f32 %v782_v43, %v2739_v46  ;;  %v919_v47 = vmax.f32 %v2824_v36, %v2828_v39 }
 0x152   : > { %920 = vmax.xlane.f32.xlu0 %v919_v47  ;;  %v922_v50 = vmax.f32 %v2832_v42, %v2835_v44 }
 0x154   : > { %v786_v53 = vpop.f32.mrb[20].mxu0  ;;  %923 = vmax.xlane.f32.xlu1 %v922_v50 }
 0x155   : > { %v2844_v54 = vadd.f32 %v786_v53, %v2737_v45  ;;  %v788_v55 = vpop.f32.mrb[21].mxu0 }
 0x156   : > { %v2847_v58 = vadd.f32 %v788_v55, %v2739_v46  ;;  %v790_v59 = vpop.f32.mrb[22].mxu0 }
 0x157   : > { %v2850_v60 = vadd.f32 %v790_v59, %v2737_v45  ;;  %v792_v61 = vpop.f32.mrb[23].mxu0 }
 0x158   : > { %v2853_v62 = vadd.f32 %v792_v61, %v2739_v46  ;;  %v925_v63 = vmax.f32 %v2844_v54, %v2847_v58 }
 0x15a   : > { %926 = vmax.xlane.f32.xlu0 %v925_v63  ;;  %v928_v1 = vmax.f32 %v2850_v60, %v2853_v62 }
 0x15c   : > { %v796_v3 = vpop.f32.mrb[24].mxu0  ;;  %929 = vmax.xlane.f32.xlu1 %v928_v1 }
 0x15d   : > { %v2860_v4 = vadd.f32 %v796_v3, %v2737_v45  ;;  %v798_v7 = vpop.f32.mrb[25].mxu0 }
 0x15e   : > { %v2863_v8 = vadd.f32 %v798_v7, %v2739_v46  ;;  %v800_v9 = vpop.f32.mrb[26].mxu0 }
 0x15f   : > { %v2866_v11 = vadd.f32 %v800_v9, %v2737_v45  ;;  %v802_v13 = vpop.f32.mrb[27].mxu0 }
 0x160   : > { %v2869_v15 = vadd.f32 %v802_v13, %v2739_v46  ;;  %v931_v17 = vmax.f32 %v2860_v4, %v2863_v8 }
 0x162   : > { %932 = vmax.xlane.f32.xlu0 %v931_v17  ;;  %v934_v18 = vmax.f32 %v2866_v11, %v2869_v15 }
 0x164   : > { %v806_v19 = vpop.f32.mrb[28].mxu0  ;;  %935 = vmax.xlane.f32.xlu1 %v934_v18 }
 0x165   : > { %v2876_v20 = vadd.f32 %v806_v19, %v2737_v45  ;;  %v808_v21 = vpop.f32.mrb[29].mxu0 }
 0x166   : > { %v2879_v23 = vadd.f32 %v808_v21, %v2739_v46  ;;  %v810_v24 = vpop.f32.mrb[30].mxu0 }
 0x167   : > { %v2882_v26 = vadd.f32 %v810_v24, %v2737_v45  ;;  %v812_v27 = vpop.f32.mrb[31].mxu0 }
 0x168   : > { %v2885_v29 = vadd.f32 %v812_v27, %v2739_v46  ;;  %v937_v31 = vmax.f32 %v2876_v20, %v2879_v23 }
 0x16a   : > { %938 = vmax.xlane.f32.xlu0 %v937_v31  ;;  %v940_v32 = vmax.f32 %v2882_v26, %v2885_v29 }
 0x16c   : > { %v816_v33 = vpop.f32.mrb[32].mxu0  ;;  %941 = vmax.xlane.f32.xlu1 %v940_v32 }
 0x16d   : > { %v2892_v34 = vadd.f32 %v816_v33, %v2737_v45  ;;  %v818_v35 = vpop.f32.mrb[33].mxu0 }
 0x16e   : > { %v2895_v37 = vadd.f32 %v818_v35, %v2739_v46  ;;  %v820_v38 = vpop.f32.mrb[34].mxu0 }
 0x16f   : > { %v2898_v40 = vadd.f32 %v820_v38, %v2737_v45  ;;  %v822_v41 = vpop.f32.mrb[35].mxu0 }
 0x170   : > { %v2901_v43 = vadd.f32 %v822_v41, %v2739_v46  ;;  %v943_v47 = vmax.f32 %v2892_v34, %v2895_v37 }
 0x172   : > { %944 = vmax.xlane.f32.xlu0 %v943_v47  ;;  %v946_v49 = vmax.f32 %v2898_v40, %v2901_v43 }
 0x174   : > { %v826_v50 = vpop.f32.mrb[36].mxu0  ;;  %947 = vmax.xlane.f32.xlu1 %v946_v49 }
 0x175   : > { %v2908_v52 = vadd.f32 %v826_v50, %v2737_v45  ;;  %v828_v53 = vpop.f32.mrb[37].mxu0 }
 0x176   : > { %v2911_v55 = vadd.f32 %v828_v53, %v2739_v46  ;;  %v830_v59 = vpop.f32.mrb[38].mxu0 }
 0x177   : > { %v2914_v61 = vadd.f32 %v830_v59, %v2737_v45  ;;  %v832_v63 = vpop.f32.mrb[39].mxu0 }
 0x178   : > { %v2917_v1 = vadd.f32 %v832_v63, %v2739_v46  ;;  %v949_v3 = vmax.f32 %v2908_v52, %v2911_v55 }
 0x17a   : > { %950 = vmax.xlane.f32.xlu0 %v949_v3  ;;  %v952_v7 = vmax.f32 %v2914_v61, %v2917_v1 }
 0x17c   : > { %v836_v9 = vpop.f32.mrb[40].mxu0  ;;  %953 = vmax.xlane.f32.xlu1 %v952_v7 }
 0x17d   : > { %v2924_v13 = vadd.f32 %v836_v9, %v2737_v45  ;;  %v838_v17 = vpop.f32.mrb[41].mxu0 }
 0x17e   : > { %v2927_v18 = vadd.f32 %v838_v17, %v2739_v46  ;;  %v840_v19 = vpop.f32.mrb[42].mxu0 }
 0x17f   : > { %v2930_v21 = vadd.f32 %v840_v19, %v2737_v45  ;;  %v842_v24 = vpop.f32.mrb[43].mxu0 }
 0x180   : > { %v2933_v27 = vadd.f32 %v842_v24, %v2739_v46  ;;  %v955_v31 = vmax.f32 %v2924_v13, %v2927_v18 }
 0x182   : > { %956 = vmax.xlane.f32.xlu0 %v955_v31  ;;  %v958_v32 = vmax.f32 %v2930_v21, %v2933_v27 }
 0x184   : > { %v846_v33 = vpop.f32.mrb[44].mxu0  ;;  %959 = vmax.xlane.f32.xlu1 %v958_v32 }
 0x185   : > { %v2940_v35 = vadd.f32 %v846_v33, %v2737_v45  ;;  %v848_v38 = vpop.f32.mrb[45].mxu0 }
 0x186   : > { %v2943_v41 = vadd.f32 %v848_v38, %v2739_v46  ;;  %v850_v47 = vpop.f32.mrb[46].mxu0 }
 0x187   : > { %v2946_v49 = vadd.f32 %v850_v47, %v2737_v45  ;;  %v852_v50 = vpop.f32.mrb[47].mxu0 }
 0x188   : > { %v2949_v53 = vadd.f32 %v852_v50, %v2739_v46  ;;  %v961_v59 = vmax.f32 %v2940_v35, %v2943_v41 }
 0x18a   : > { %962 = vmax.xlane.f32.xlu0 %v961_v59  ;;  %v964_v63 = vmax.f32 %v2946_v49, %v2949_v53 }
 0x18c   : > { %v856_v3 = vpop.f32.mrb[48].mxu0  ;;  %965 = vmax.xlane.f32.xlu1 %v964_v63 }
 0x18d   : > { %v2956_v7 = vadd.f32 %v856_v3, %v2737_v45  ;;  %v858_v9 = vpop.f32.mrb[49].mxu0 }
 0x18e   : > { %v2959_v17 = vadd.f32 %v858_v9, %v2739_v46  ;;  %v860_v19 = vpop.f32.mrb[50].mxu0 }
 0x18f   : > { %v2962_v24 = vadd.f32 %v860_v19, %v2737_v45  ;;  %v862_v31 = vpop.f32.mrb[51].mxu0 }
 0x190   : > { %3186 = vst [vmem:[#allocation2_spill] sm:$0xff] %v2959_v17  ;;  %v2965_v32 = vadd.f32 %v862_v31, %v2739_v46  ;;  %v967_v33 = vmax.f32 %v2956_v7, %v2959_v17 }
 0x191   : > { %3187 = vst [vmem:[#allocation3_spill] sm:$0xff] %v2962_v24 }
 0x192   : > { %3188 = vst [vmem:[#allocation4_spill] sm:$0xff] %v2965_v32  ;;  %968 = vmax.xlane.f32.xlu0 %v967_v33  ;;  %v970_v38 = vmax.f32 %v2962_v24, %v2965_v32 }
 0x194   : > { %v866_v47 = vpop.f32.mrb[52].mxu0  ;;  %971 = vmax.xlane.f32.xlu1 %v970_v38 }
 0x195   : > { %v2972_v50 = vadd.f32 %v866_v47, %v2737_v45  ;;  %v868_v59 = vpop.f32.mrb[53].mxu0 }
 0x196   : > { %v2975_v63 = vadd.f32 %v868_v59, %v2739_v46  ;;  %v870_v3 = vpop.f32.mrb[54].mxu0 }
 0x197   : > { %3189 = vst [vmem:[#allocation5_spill] sm:$0xff] %v2972_v50  ;;  %v2978_v9 = vadd.f32 %v870_v3, %v2737_v45  ;;  %v872_v19 = vpop.f32.mrb[55].mxu0 }
 0x198   : > { %3190 = vst [vmem:[#allocation6_spill] sm:$0xff] %v2975_v63  ;;  %v2981_v31 = vadd.f32 %v872_v19, %v2739_v46  ;;  %v973_v33 = vmax.f32 %v2972_v50, %v2975_v63 }
 0x199   : > { %3191 = vst [vmem:[#allocation7_spill] sm:$0xff] %v2978_v9 }
 0x19a   : > { %3192 = vst [vmem:[#allocation8_spill] sm:$0xff] %v2981_v31  ;;  %974 = vmax.xlane.f32.xlu0 %v973_v33  ;;  %v976_v38 = vmax.f32 %v2978_v9, %v2981_v31 }
 0x19c   : > { %v876_v47 = vpop.f32.mrb[56].mxu0  ;;  %977 = vmax.xlane.f32.xlu1 %v976_v38 }
 0x19d   : > { %v2988_v59 = vadd.f32 %v876_v47, %v2737_v45  ;;  %v878_v32 = vpop.f32.mrb[57].mxu0 }
 0x19e   : > { %v2991_v3 = vadd.f32 %v878_v32, %v2739_v46  ;;  %v880_v24 = vpop.f32.mrb[58].mxu0 }
 0x19f   : > { %v2994_v19 = vadd.f32 %v880_v24, %v2737_v45  ;;  %v882_v17 = vpop.f32.mrb[59].mxu0 }
 0x1a0   : > { %3193 = vst [vmem:[#allocation9_spill] sm:$0xff] %v2991_v3  ;;  %v2997_v63 = vadd.f32 %v882_v17, %v2739_v46  ;;  %v979_v33 = vmax.f32 %v2988_v59, %v2991_v3 }
 0x1a1   : > { %3194 = vst [vmem:[#allocation10_spill] sm:$0xff] %v2994_v19 }
 0x1a2   : > { %3195 = vst [vmem:[#allocation11_spill] sm:$0xff] %v2997_v63  ;;  %980 = vmax.xlane.f32.xlu0 %v979_v33  ;;  %v982_v38 = vmax.f32 %v2994_v19, %v2997_v63 }
 0x1a4   : > { %v886_v47 = vpop.f32.mrb[60].mxu0  ;;  %983 = vmax.xlane.f32.xlu1 %v982_v38 }
 0x1a5   : > { %v3004_v32 = vadd.f32 %v886_v47, %v2737_v45  ;;  %v888_v31 = vpop.f32.mrb[61].mxu0 }
 0x1a6   : > { %v3007_v24 = vadd.f32 %v888_v31, %v2739_v46  ;;  %v890_v9 = vpop.f32.mrb[62].mxu0 }
 0x1a7   : > { %3196 = vst [vmem:[#allocation12_spill] sm:$0xff] %v3004_v32  ;;  %v3010_v17 = vadd.f32 %v890_v9, %v2737_v45  ;;  %v892_v50 = vpop.f32.mrb[63].mxu0 }
 0x1a8   : > { %3197 = vst [vmem:[#allocation13_spill] sm:$0xff] %v3007_v24  ;;  %v3013_v3 = vadd.f32 %v892_v50, %v2739_v46  ;;  %v985_v33 = vmax.f32 %v3004_v32, %v3007_v24 }
 0x1aa   : > { %3198 = vst [vmem:[#allocation14_spill] sm:$0xff] %v3013_v3  ;;  %986 = vmax.xlane.f32.xlu0 %v985_v33  ;;  %v988_v38 = vmax.f32 %v3010_v17, %v3013_v3 }
 0x1ac   : > { %989 = vmax.xlane.f32.xlu1 %v988_v38 }
 0x1bf   : > { %v897_v47 = vpop.xlane.xlu0 %896 }
 0x1c0   : > { %v991_v31 = vsub.f32 %v2748_v48, %v897_v47  ;;  %v992_v63 = vsub.f32 %v2752_v51, %v897_v47 }
 0x1c2   : > { %v1055_v19 = vmul.f32 1.442695, %v991_v31  ;;  %v1057_v45 = vmul.f32 1.442695, %v992_v63 }
 0x1c3   : > { %v900_v9 = vpop.xlane.xlu0 %899 }
 0x1c4   : > { %2353 = vpow2.f32 %v1055_v19  ;;  %v993_v46 = vsub.f32 %v2757_v56, %v900_v9  ;;  %v994_v50 = vsub.f32 %v2760_v57, %v900_v9 }
 0x1c5   : > { %2355 = vpow2.f32 %v1057_v45 }
 0x1c6   : > { %v1059_v24 = vmul.f32 1.442695, %v993_v46  ;;  %v1061_v33 = vmul.f32 1.442695, %v994_v50 }
 0x1c7   : > { %v903_v32 = vpop.xlane.xlu1 %902 }
 0x1c8   : > { %2357 = vpow2.f32 %v1059_v24  ;;  %v995_v38 = vsub.f32 %v2770_v0, %v903_v32  ;;  %v996_v3 = vsub.f32 %v2773_v2, %v903_v32 }
 0x1c9   : > { %2359 = vpow2.f32 %v1061_v33 }
 0x1ca   : > { %v1063_v48 = vmul.f32 1.442695, %v995_v38  ;;  %v1065_v51 = vmul.f32 1.442695, %v996_v3 }
 0x1cb   : > { %v906_v47 = vpop.xlane.xlu1 %905 }
 0x1cc   : > { %2361 = vpow2.f32 %v1063_v48  ;;  %v997_v63 = vsub.f32 %v2776_v5, %v906_v47  ;;  %v998_v56 = vsub.f32 %v2779_v6, %v906_v47 }
 0x1cd   : > { %2363 = vpow2.f32 %v1065_v51 }
 0x1ce   : > { %v2354_v57 = vpop.eup %2353  ;;  %v1067_v19 = vmul.f32 1.442695, %v997_v63  ;;  %v1069_v31 = vmul.f32 1.442695, %v998_v56 }
 0x1cf   : > { %v2356_v45 = vpop.eup %2355  ;;  %v909_v9 = vpop.xlane.xlu0 %908 }
 0x1d0   : > { %2365 = vpow2.f32 %v1067_v19  ;;  %v999_v0 = vsub.f32 %v2786_v10, %v909_v9  ;;  %v1000_v2 = vsub.f32 %v2789_v12, %v909_v9  ;;  %v1183_v32 = vadd.f32 %v2356_v45, %v2354_v57 }
 0x1d1   : > { %2367 = vpow2.f32 %v1069_v31  ;;  %v912_v3 = vpop.xlane.xlu1 %911 }
 0x1d2   : > { %v2358_v24 = vpop.eup %2357  ;;  %v1071_v46 = vmul.f32 1.442695, %v999_v0  ;;  %v1073_v50 = vmul.f32 1.442695, %v1000_v2  ;;  %v1001_v5 = vsub.f32 %v2792_v14, %v912_v3  ;;  %v1002_v6 = vsub.f32 %v2795_v16, %v912_v3  ;;  %1184 = vadd.xlane.f32.xlu0 %v1183_v32 }
 0x1d3   : > { %v2360_v33 = vpop.eup %2359  ;;  %v1279_v38 = vpack.c.bf16 %v2358_v24, %v2354_v57 }
 0x1d4   : > { %2369 = vpow2.f32 %v1071_v46  ;;  %v1075_v48 = vmul.f32 1.442695, %v1001_v5  ;;  %v1077_v51 = vmul.f32 1.442695, %v1002_v6  ;;  %v1280_v47 = vpack.c.bf16 %v2360_v33, %v2356_v45 }
 0x1d5   : > { %2371 = vpow2.f32 %v1073_v50  ;;  %v1186_v10 = vadd.f32 %v2360_v33, %v2358_v24 }
 0x1d6   : > { %v2362_v12 = vpop.eup %2361  ;;  %2373 = vpow2.f32 %v1075_v48  ;;  %1439 = vmatprep.mubr.bf16.mxu1 %v1280_v47 }
 0x1d7   : > { %v2364_v63 = vpop.eup %2363  ;;  %2375 = vpow2.f32 %v1077_v51  ;;  %1187 = vadd.xlane.f32.xlu1 %v1186_v10  ;;  %1440 = vmatmul.mubr.bf16.vlgmr.msra.gmra.mrb[0].mxu1 %v1279_v38  ;;  %v915_v56 = vpop.xlane.xlu0 %914 }
 0x1d8   : > { %v1003_v14 = vsub.f32 %v2804_v22, %v915_v56  ;;  %v1004_v16 = vsub.f32 %v2808_v25, %v915_v56  ;;  %v1189_v19 = vadd.f32 %v2364_v63, %v2362_v12 }
 0x1d9   : > { %v918_v57 = vpop.xlane.xlu1 %917 }
 0x1da   : > { %v2366_v31 = vpop.eup %2365  ;;  %v1079_v9 = vmul.f32 1.442695, %v1003_v14  ;;  %v1081_v0 = vmul.f32 1.442695, %v1004_v16  ;;  %v1005_v45 = vsub.f32 %v2812_v28, %v918_v57  ;;  %v1006_v2 = vsub.f32 %v2815_v30, %v918_v57  ;;  %1190 = vadd.xlane.f32.xlu0 %v1189_v19 }
 0x1db   : > { %v2368_v32 = vpop.eup %2367  ;;  %v1281_v3 = vpack.c.bf16 %v2366_v31, %v2362_v12 }
 0x1dc   : > { %2377 = vpow2.f32 %v1079_v9  ;;  %v1083_v24 = vmul.f32 1.442695, %v1005_v45  ;;  %v1085_v46 = vmul.f32 1.442695, %v1006_v2  ;;  %v1282_v50 = vpack.c.bf16 %v2368_v32, %v2364_v63 }
 0x1dd   : > { %2379 = vpow2.f32 %v1081_v0  ;;  %v1192_v22 = vadd.f32 %v2368_v32, %v2366_v31 }
 0x1de   : > { %v2370_v5 = vpop.eup %2369  ;;  %2381 = vpow2.f32 %v1083_v24  ;;  %1447 = vmatprep.mubr.bf16.mxu1 %v1282_v50 }
 0x1df   : > { %v2372_v25 = vpop.eup %2371  ;;  %2383 = vpow2.f32 %v1085_v46  ;;  %1193 = vadd.xlane.f32.xlu1 %v1192_v22  ;;  %1448 = vmatmul.mubr.bf16.gmra.mrb[4].mxu1 %v1281_v3  ;;  %v921_v6 = vpop.xlane.xlu0 %920 }
 0x1e0   : > { %v2374_v28 = vpop.eup %2373  ;;  %v1007_v30 = vsub.f32 %v2824_v36, %v921_v6  ;;  %v1008_v33 = vsub.f32 %v2828_v39, %v921_v6  ;;  %v1195_v38 = vadd.f32 %v2372_v25, %v2370_v5 }
 0x1e1   : > { %v2376_v48 = vpop.eup %2375  ;;  %v924_v51 = vpop.xlane.xlu1 %923  ;;  %v1283_v36 = vpack.c.bf16 %v2374_v28, %v2370_v5 }
 0x1e2   : > { %v1087_v47 = vmul.f32 1.442695, %v1007_v30  ;;  %v1089_v10 = vmul.f32 1.442695, %v1008_v33  ;;  %v1009_v12 = vsub.f32 %v2832_v42, %v924_v51  ;;  %v1010_v63 = vsub.f32 %v2835_v44, %v924_v51  ;;  %1196 = vadd.xlane.f32.xlu0 %v1195_v38 }
 0x1e3   : > { %v1198_v56 = vadd.f32 %v2376_v48, %v2374_v28  ;;  %v1284_v14 = vpack.c.bf16 %v2376_v48, %v2372_v25 }
 0x1e4   : > { %2385 = vpow2.f32 %v1087_v47  ;;  %v1091_v16 = vmul.f32 1.442695, %v1009_v12  ;;  %v1093_v19 = vmul.f32 1.442695, %v1010_v63 }
 0x1e5   : > { %2387 = vpow2.f32 %v1089_v10  ;;  %1199 = vadd.xlane.f32.xlu1 %v1198_v56  ;;  %1455 = vmatprep.mubr.bf16.mxu1 %v1284_v14 }
 0x1e6   : > { %v2378_v39 = vpop.eup %2377  ;;  %2389 = vpow2.f32 %v1091_v16 }
 0x1e7   : > { %v2380_v57 = vpop.eup %2379  ;;  %2391 = vpow2.f32 %v1093_v19  ;;  %1456 = vmatmul.mubr.bf16.gmra.mrb[8].mxu1 %v1283_v36  ;;  %v927_v31 = vpop.xlane.xlu0 %926 }
 0x1e8   : > { %v2382_v9 = vpop.eup %2381  ;;  %v1011_v42 = vsub.f32 %v2844_v54, %v927_v31  ;;  %v1012_v44 = vsub.f32 %v2847_v58, %v927_v31  ;;  %v1201_v0 = vadd.f32 %v2380_v57, %v2378_v39 }
 0x1e9   : > { %v2384_v45 = vpop.eup %2383  ;;  %v930_v2 = vpop.xlane.xlu1 %929  ;;  %v1285_v54 = vpack.c.bf16 %v2382_v9, %v2378_v39 }
 0x1ea   : > { %v1095_v32 = vmul.f32 1.442695, %v1011_v42  ;;  %v1097_v3 = vmul.f32 1.442695, %v1012_v44  ;;  %v1013_v24 = vsub.f32 %v2850_v60, %v930_v2  ;;  %v1014_v46 = vsub.f32 %v2853_v62, %v930_v2  ;;  %1202 = vadd.xlane.f32.xlu0 %v1201_v0 }
 0x1eb   : > { %v1204_v50 = vadd.f32 %v2384_v45, %v2382_v9  ;;  %v1286_v22 = vpack.c.bf16 %v2384_v45, %v2380_v57 }
 0x1ec   : > { %2393 = vpow2.f32 %v1095_v32  ;;  %v1099_v5 = vmul.f32 1.442695, %v1013_v24  ;;  %v1101_v25 = vmul.f32 1.442695, %v1014_v46 }
 0x1ed   : > { %2395 = vpow2.f32 %v1097_v3  ;;  %1205 = vadd.xlane.f32.xlu1 %v1204_v50  ;;  %1463 = vmatprep.mubr.bf16.mxu1 %v1286_v22 }
 0x1ee   : > { %v2386_v58 = vpop.eup %2385  ;;  %2397 = vpow2.f32 %v1099_v5 }
 0x1ef   : > { %v2388_v6 = vpop.eup %2387  ;;  %2399 = vpow2.f32 %v1101_v25  ;;  %1464 = vmatmul.mubr.bf16.gmra.mrb[12].mxu1 %v1285_v54  ;;  %v933_v28 = vpop.xlane.xlu0 %932 }
 0x1f0   : > { %v2390_v30 = vpop.eup %2389  ;;  %v1015_v60 = vsub.f32 %v2860_v4, %v933_v28  ;;  %v1016_v62 = vsub.f32 %v2863_v8, %v933_v28  ;;  %v1207_v33 = vadd.f32 %v2388_v6, %v2386_v58 }
 0x1f1   : > { %v2392_v38 = vpop.eup %2391  ;;  %v936_v48 = vpop.xlane.xlu1 %935  ;;  %v1287_v4 = vpack.c.bf16 %v2390_v30, %v2386_v58 }
 0x1f2   : > { %v1103_v51 = vmul.f32 1.442695, %v1015_v60  ;;  %v1105_v47 = vmul.f32 1.442695, %v1016_v62  ;;  %v1017_v10 = vsub.f32 %v2866_v11, %v936_v48  ;;  %v1018_v12 = vsub.f32 %v2869_v15, %v936_v48  ;;  %1208 = vadd.xlane.f32.xlu0 %v1207_v33 }
 0x1f3   : > { %v1210_v63 = vadd.f32 %v2392_v38, %v2390_v30  ;;  %v1288_v56 = vpack.c.bf16 %v2392_v38, %v2388_v6 }
 0x1f4   : > { %2401 = vpow2.f32 %v1103_v51  ;;  %v1107_v14 = vmul.f32 1.442695, %v1017_v10  ;;  %v1109_v16 = vmul.f32 1.442695, %v1018_v12 }
 0x1f5   : > { %2403 = vpow2.f32 %v1105_v47  ;;  %1211 = vadd.xlane.f32.xlu1 %v1210_v63  ;;  %1471 = vmatprep.mubr.bf16.mxu1 %v1288_v56 }
 0x1f6   : > { %v2394_v8 = vpop.eup %2393  ;;  %2405 = vpow2.f32 %v1107_v14 }
 0x1f7   : > { %v2396_v19 = vpop.eup %2395  ;;  %2407 = vpow2.f32 %v1109_v16  ;;  %1472 = vmatmul.mubr.bf16.gmra.mrb[16].mxu1 %v1287_v4  ;;  %v939_v36 = vpop.xlane.xlu0 %938 }
 0x1f8   : > { %v2398_v39 = vpop.eup %2397  ;;  %v1019_v11 = vsub.f32 %v2876_v20, %v939_v36  ;;  %v1020_v15 = vsub.f32 %v2879_v23, %v939_v36  ;;  %v1213_v57 = vadd.f32 %v2396_v19, %v2394_v8 }
 0x1f9   : > { %v2400_v31 = vpop.eup %2399  ;;  %v942_v9 = vpop.xlane.xlu1 %941  ;;  %v1289_v20 = vpack.c.bf16 %v2398_v39, %v2394_v8 }
 0x1fa   : > { %v1111_v42 = vmul.f32 1.442695, %v1019_v11  ;;  %v1113_v44 = vmul.f32 1.442695, %v1020_v15  ;;  %v1021_v0 = vsub.f32 %v2882_v26, %v942_v9  ;;  %v1022_v45 = vsub.f32 %v2885_v29, %v942_v9  ;;  %1214 = vadd.xlane.f32.xlu0 %v1213_v57 }
 0x1fb   : > { %v1216_v2 = vadd.f32 %v2400_v31, %v2398_v39  ;;  %v1290_v32 = vpack.c.bf16 %v2400_v31, %v2396_v19 }
 0x1fc   : > { %2409 = vpow2.f32 %v1111_v42  ;;  %v1115_v3 = vmul.f32 1.442695, %v1021_v0  ;;  %v1117_v24 = vmul.f32 1.442695, %v1022_v45 }
 0x1fd   : > { %2411 = vpow2.f32 %v1113_v44  ;;  %1217 = vadd.xlane.f32.xlu1 %v1216_v2  ;;  %1479 = vmatprep.mubr.bf16.mxu1 %v1290_v32 }
 0x1fe   : > { %v2402_v23 = vpop.eup %2401  ;;  %2413 = vpow2.f32 %v1115_v3 }
 0x1ff   : > { %v2404_v46 = vpop.eup %2403  ;;  %2415 = vpow2.f32 %v1117_v24  ;;  %1480 = vmatmul.mubr.bf16.gmra.mrb[20].mxu1 %v1289_v20  ;;  %v945_v50 = vpop.xlane.xlu0 %944 }
 0x200   : > { %v2406_v22 = vpop.eup %2405  ;;  %v1023_v26 = vsub.f32 %v2892_v34, %v945_v50  ;;  %v1024_v29 = vsub.f32 %v2895_v37, %v945_v50  ;;  %v1219_v5 = vadd.f32 %v2404_v46, %v2402_v23 }
 0x201   : > { %v2408_v25 = vpop.eup %2407  ;;  %v948_v54 = vpop.xlane.xlu1 %947  ;;  %v1291_v34 = vpack.c.bf16 %v2406_v22, %v2402_v23 }
 0x202   : > { %v1119_v58 = vmul.f32 1.442695, %v1023_v26  ;;  %v1121_v6 = vmul.f32 1.442695, %v1024_v29  ;;  %v1025_v28 = vsub.f32 %v2898_v40, %v948_v54  ;;  %v1026_v30 = vsub.f32 %v2901_v43, %v948_v54  ;;  %1220 = vadd.xlane.f32.xlu0 %v1219_v5 }
 0x203   : > { %v1222_v60 = vadd.f32 %v2408_v25, %v2406_v22  ;;  %v1292_v62 = vpack.c.bf16 %v2408_v25, %v2404_v46 }
 0x204   : > { %2417 = vpow2.f32 %v1119_v58  ;;  %v1123_v33 = vmul.f32 1.442695, %v1025_v28  ;;  %v1125_v38 = vmul.f32 1.442695, %v1026_v30 }
 0x205   : > { %2419 = vpow2.f32 %v1121_v6  ;;  %1223 = vadd.xlane.f32.xlu1 %v1222_v60  ;;  %1487 = vmatprep.mubr.bf16.mxu1 %v1292_v62 }
 0x206   : > { %v2410_v37 = vpop.eup %2409  ;;  %2421 = vpow2.f32 %v1123_v33 }
 0x207   : > { %v2412_v48 = vpop.eup %2411  ;;  %2423 = vpow2.f32 %v1125_v38  ;;  %1488 = vmatmul.mubr.bf16.gmra.mrb[24].mxu1 %v1291_v34  ;;  %v951_v51 = vpop.xlane.xlu0 %950 }
 0x208   : > { %v2414_v47 = vpop.eup %2413  ;;  %v1027_v40 = vsub.f32 %v2908_v52, %v951_v51  ;;  %v1028_v43 = vsub.f32 %v2911_v55, %v951_v51  ;;  %v1225_v10 = vadd.f32 %v2412_v48, %v2410_v37 }
 0x209   : > { %v2416_v12 = vpop.eup %2415  ;;  %v954_v63 = vpop.xlane.xlu1 %953  ;;  %v1293_v52 = vpack.c.bf16 %v2414_v47, %v2410_v37 }
 0x20a   : > { %v1127_v56 = vmul.f32 1.442695, %v1027_v40  ;;  %v1129_v14 = vmul.f32 1.442695, %v1028_v43  ;;  %v1029_v16 = vsub.f32 %v2914_v61, %v954_v63  ;;  %v1030_v4 = vsub.f32 %v2917_v1, %v954_v63  ;;  %1226 = vadd.xlane.f32.xlu0 %v1225_v10  ;;  %v3200_v43 = vld [vmem:[#allocation3_spill] sm:$0xff] }
 0x20b   : > { %v1228_v8 = vadd.f32 %v2416_v12, %v2414_v47  ;;  %v1294_v19 = vpack.c.bf16 %v2416_v12, %v2412_v48  ;;  %v3201_v12 = vld [vmem:[#allocation4_spill] sm:$0xff] }
 0x20c   : > { %2425 = vpow2.f32 %v1127_v56  ;;  %v1131_v36 = vmul.f32 1.442695, %v1029_v16  ;;  %v1133_v39 = vmul.f32 1.442695, %v1030_v4 }
 0x20d   : > { %2427 = vpow2.f32 %v1129_v14  ;;  %1229 = vadd.xlane.f32.xlu1 %v1228_v8  ;;  %1495 = vmatprep.mubr.bf16.mxu1 %v1294_v19 }
 0x20e   : > { %v2418_v55 = vpop.eup %2417  ;;  %2429 = vpow2.f32 %v1131_v36 }
 0x20f   : > { %v2420_v11 = vpop.eup %2419  ;;  %2431 = vpow2.f32 %v1133_v39  ;;  %1496 = vmatmul.mubr.bf16.gmra.mrb[28].mxu1 %v1293_v52  ;;  %v957_v15 = vpop.xlane.xlu0 %956  ;;  %v3202_v52 = vld [vmem:[#allocation5_spill] sm:$0xff] }
 0x210   : > { %v2422_v57 = vpop.eup %2421  ;;  %v1031_v61 = vsub.f32 %v2924_v13, %v957_v15  ;;  %v1032_v1 = vsub.f32 %v2927_v18, %v957_v15  ;;  %v1231_v31 = vadd.f32 %v2420_v11, %v2418_v55 }
 0x211   : > { %v2424_v9 = vpop.eup %2423  ;;  %v960_v42 = vpop.xlane.xlu1 %959  ;;  %v1295_v13 = vpack.c.bf16 %v2422_v57, %v2418_v55 }
 0x212   : > { %v1135_v44 = vmul.f32 1.442695, %v1031_v61  ;;  %v1137_v0 = vmul.f32 1.442695, %v1032_v1  ;;  %v1033_v45 = vsub.f32 %v2930_v21, %v960_v42  ;;  %v1034_v2 = vsub.f32 %v2933_v27, %v960_v42  ;;  %1232 = vadd.xlane.f32.xlu0 %v1231_v31  ;;  %v3204_v42 = vld [vmem:[#allocation7_spill] sm:$0xff] }
 0x213   : > { %v1234_v32 = vadd.f32 %v2424_v9, %v2422_v57  ;;  %v1296_v3 = vpack.c.bf16 %v2424_v9, %v2420_v11  ;;  %v3203_v11 = vld [vmem:[#allocation6_spill] sm:$0xff] }
 0x214   : > { %2433 = vpow2.f32 %v1135_v44  ;;  %v1139_v24 = vmul.f32 1.442695, %v1033_v45  ;;  %v1141_v20 = vmul.f32 1.442695, %v1034_v2 }
 0x215   : > { %2435 = vpow2.f32 %v1137_v0  ;;  %1235 = vadd.xlane.f32.xlu1 %v1234_v32  ;;  %1503 = vmatprep.mubr.bf16.mxu1 %v1296_v3  ;;  %v3205_v0 = vld [vmem:[#allocation8_spill] sm:$0xff] }
 0x216   : > { %v2426_v18 = vpop.eup %2425  ;;  %2437 = vpow2.f32 %v1139_v24 }
 0x217   : > { %v2428_v23 = vpop.eup %2427  ;;  %2439 = vpow2.f32 %v1141_v20  ;;  %1504 = vmatmul.mubr.bf16.gmra.mrb[32].mxu1 %v1295_v13  ;;  %v963_v46 = vpop.xlane.xlu0 %962 }
 0x218   : > { %v2430_v50 = vpop.eup %2429  ;;  %v1035_v21 = vsub.f32 %v2940_v35, %v963_v46  ;;  %v1036_v27 = vsub.f32 %v2943_v41, %v963_v46  ;;  %v1237_v22 = vadd.f32 %v2428_v23, %v2426_v18 }
 0x219   : > { %v2432_v26 = vpop.eup %2431  ;;  %v966_v29 = vpop.xlane.xlu1 %965  ;;  %v1297_v35 = vpack.c.bf16 %v2430_v50, %v2426_v18 }
 0x21a   : > { %v1143_v5 = vmul.f32 1.442695, %v1035_v21  ;;  %v1145_v25 = vmul.f32 1.442695, %v1036_v27  ;;  %v1037_v54 = vsub.f32 %v2946_v49, %v966_v29  ;;  %v1038_v58 = vsub.f32 %v2949_v53, %v966_v29  ;;  %1238 = vadd.xlane.f32.xlu0 %v1237_v22  ;;  %v3199_v53 = vld [vmem:[#allocation2_spill] sm:$0xff]  ;;  %v3206_v21 = vld [vmem:[#allocation9_spill] sm:$0xff] }
 0x21b   : > { %v1240_v6 = vadd.f32 %v2432_v26, %v2430_v50  ;;  %v1298_v28 = vpack.c.bf16 %v2432_v26, %v2428_v23 }
 0x21c   : > { %2441 = vpow2.f32 %v1143_v5  ;;  %v1147_v30 = vmul.f32 1.442695, %v1037_v54  ;;  %v1149_v60 = vmul.f32 1.442695, %v1038_v58  ;;  %v3207_v54 = vld [vmem:[#allocation10_spill] sm:$0xff] }
 0x21d   : > { %2443 = vpow2.f32 %v1145_v25  ;;  %1241 = vadd.xlane.f32.xlu1 %v1240_v6  ;;  %1511 = vmatprep.mubr.bf16.mxu1 %v1298_v28  ;;  %v3208_v6 = vld [vmem:[#allocation11_spill] sm:$0xff] }
 0x21e   : > { %v2434_v41 = vpop.eup %2433  ;;  %2445 = vpow2.f32 %v1147_v30 }
 0x21f   : > { %v2436_v62 = vpop.eup %2435  ;;  %2447 = vpow2.f32 %v1149_v60  ;;  %1512 = vmatmul.mubr.bf16.gmra.mrb[36].mxu1 %v1297_v35  ;;  %v969_v33 = vpop.xlane.xlu0 %968 }
 0x220   : > { %v2438_v38 = vpop.eup %2437  ;;  %v1039_v49 = vsub.f32 %v2956_v7, %v969_v33  ;;  %v1040_v34 = vsub.f32 %v3199_v53, %v969_v33  ;;  %v1243_v37 = vadd.f32 %v2436_v62, %v2434_v41  ;;  %v3209_v53 = vld [vmem:[#allocation12_spill] sm:$0xff] }
 0x221   : > { %v2440_v48 = vpop.eup %2439  ;;  %v972_v51 = vpop.xlane.xlu1 %971  ;;  %v1299_v7 = vpack.c.bf16 %v2438_v38, %v2434_v41 }
 0x222   : > { %v1151_v47 = vmul.f32 1.442695, %v1039_v49  ;;  %v1153_v40 = vmul.f32 1.442695, %v1040_v34  ;;  %v1041_v10 = vsub.f32 %v3200_v43, %v972_v51  ;;  %v1042_v63 = vsub.f32 %v3201_v12, %v972_v51  ;;  %1244 = vadd.xlane.f32.xlu0 %v1243_v37  ;;  %v3210_v37 = vld [vmem:[#allocation13_spill] sm:$0xff] }
 0x223   : > { %v1246_v56 = vadd.f32 %v2440_v48, %v2438_v38  ;;  %v1300_v14 = vpack.c.bf16 %v2440_v48, %v2436_v62 }
 0x224   : > { %2449 = vpow2.f32 %v1151_v47  ;;  %v1155_v16 = vmul.f32 1.442695, %v1041_v10  ;;  %v1157_v4 = vmul.f32 1.442695, %v1042_v63  ;;  %v3211_v63 = vld [vmem:[#allocation14_spill] sm:$0xff] }
 0x225   : > { %2451 = vpow2.f32 %v1153_v40  ;;  %1247 = vadd.xlane.f32.xlu1 %v1246_v56  ;;  %1519 = vmatprep.mubr.bf16.mxu1 %v1300_v14 }
 0x226   : > { %v2442_v8 = vpop.eup %2441  ;;  %2453 = vpow2.f32 %v1155_v16 }
 0x227   : > { %v2444_v19 = vpop.eup %2443  ;;  %2455 = vpow2.f32 %v1157_v4  ;;  %1520 = vmatmul.mubr.bf16.gmra.mrb[40].mxu1 %v1299_v7  ;;  %v975_v36 = vpop.xlane.xlu0 %974 }
 0x228   : > { %v2446_v39 = vpop.eup %2445  ;;  %v1043_v55 = vsub.f32 %v3202_v52, %v975_v36  ;;  %v1044_v15 = vsub.f32 %v3203_v11, %v975_v36  ;;  %v1249_v57 = vadd.f32 %v2444_v19, %v2442_v8 }
 0x229   : > { %v2448_v61 = vpop.eup %2447  ;;  %v978_v1 = vpop.xlane.xlu1 %977  ;;  %v1301_v20 = vpack.c.bf16 %v2446_v39, %v2442_v8 }
 0x22a   : > { %v1159_v31 = vmul.f32 1.442695, %v1043_v55  ;;  %v1161_v9 = vmul.f32 1.442695, %v1044_v15  ;;  %v1045_v44 = vsub.f32 %v3204_v42, %v978_v1  ;;  %v1046_v45 = vsub.f32 %v3205_v0, %v978_v1  ;;  %1250 = vadd.xlane.f32.xlu0 %v1249_v57 }
 0x22b   : > { %v1252_v2 = vadd.f32 %v2448_v61, %v2446_v39  ;;  %v1302_v32 = vpack.c.bf16 %v2448_v61, %v2444_v19 }
 0x22c   : > { %2457 = vpow2.f32 %v1159_v31  ;;  %v1163_v3 = vmul.f32 1.442695, %v1045_v44  ;;  %v1165_v24 = vmul.f32 1.442695, %v1046_v45 }
 0x22d   : > { %2459 = vpow2.f32 %v1161_v9  ;;  %1253 = vadd.xlane.f32.xlu1 %v1252_v2  ;;  %1527 = vmatprep.mubr.bf16.mxu1 %v1302_v32 }
 0x22e   : > { %v2450_v13 = vpop.eup %2449  ;;  %2461 = vpow2.f32 %v1163_v3 }
 0x22f   : > { %v2452_v18 = vpop.eup %2451  ;;  %2463 = vpow2.f32 %v1165_v24  ;;  %1528 = vmatmul.mubr.bf16.gmra.mrb[44].mxu1 %v1301_v20  ;;  %v981_v23 = vpop.xlane.xlu0 %980 }
 0x230   : > { %v2454_v46 = vpop.eup %2453  ;;  %v1047_v50 = vsub.f32 %v2988_v59, %v981_v23  ;;  %v1048_v27 = vsub.f32 %v3206_v21, %v981_v23  ;;  %v1255_v22 = vadd.f32 %v2452_v18, %v2450_v13 }
 0x231   : > { %v2456_v26 = vpop.eup %2455  ;;  %v984_v29 = vpop.xlane.xlu1 %983  ;;  %v1303_v59 = vpack.c.bf16 %v2454_v46, %v2450_v13 }
 0x232   : > { %v1167_v5 = vmul.f32 1.442695, %v1047_v50  ;;  %v1169_v25 = vmul.f32 1.442695, %v1048_v27  ;;  %v1049_v58 = vsub.f32 %v3207_v54, %v984_v29  ;;  %v1050_v28 = vsub.f32 %v3208_v6, %v984_v29  ;;  %1256 = vadd.xlane.f32.xlu0 %v1255_v22 }
 0x233   : > { %v1258_v30 = vadd.f32 %v2456_v26, %v2454_v46  ;;  %v1304_v60 = vpack.c.bf16 %v2456_v26, %v2452_v18 }
 0x234   : > { %2465 = vpow2.f32 %v1167_v5  ;;  %v1171_v35 = vmul.f32 1.442695, %v1049_v58  ;;  %v1173_v41 = vmul.f32 1.442695, %v1050_v28 }
 0x235   : > { %2467 = vpow2.f32 %v1169_v25  ;;  %1259 = vadd.xlane.f32.xlu1 %v1258_v30  ;;  %1535 = vmatprep.mubr.bf16.mxu1 %v1304_v60 }
 0x236   : > { %v2458_v62 = vpop.eup %2457  ;;  %2469 = vpow2.f32 %v1171_v35 }
 0x237   : > { %v2460_v33 = vpop.eup %2459  ;;  %2471 = vpow2.f32 %v1173_v41  ;;  %1536 = vmatmul.mubr.bf16.gmra.mrb[48].mxu1 %v1303_v59  ;;  %v987_v38 = vpop.xlane.xlu0 %986 }
 0x238   : > { %v2462_v49 = vpop.eup %2461  ;;  %v1051_v34 = vsub.f32 %v3209_v53, %v987_v38  ;;  %v1052_v48 = vsub.f32 %v3210_v37, %v987_v38  ;;  %v1261_v51 = vadd.f32 %v2460_v33, %v2458_v62 }
 0x239   : > { %v2464_v47 = vpop.eup %2463  ;;  %v990_v40 = vpop.xlane.xlu1 %989  ;;  %v1305_v8 = vpack.c.bf16 %v2462_v49, %v2458_v62 }
 0x23a   : > { %v1175_v43 = vmul.f32 1.442695, %v1051_v34  ;;  %v1177_v10 = vmul.f32 1.442695, %v1052_v48  ;;  %v1053_v12 = vsub.f32 %v3010_v17, %v990_v40  ;;  %v1054_v56 = vsub.f32 %v3211_v63, %v990_v40  ;;  %1262 = vadd.xlane.f32.xlu0 %v1261_v51 }
 0x23b   : > { %v1264_v14 = vadd.f32 %v2464_v47, %v2462_v49  ;;  %v1306_v16 = vpack.c.bf16 %v2464_v47, %v2460_v33 }
 0x23c   : > { %2473 = vpow2.f32 %v1175_v43  ;;  %v1179_v4 = vmul.f32 1.442695, %v1053_v12  ;;  %v1181_v7 = vmul.f32 1.442695, %v1054_v56 }
 0x23d   : > { %2475 = vpow2.f32 %v1177_v10  ;;  %1265 = vadd.xlane.f32.xlu1 %v1264_v14  ;;  %1543 = vmatprep.mubr.bf16.mxu1 %v1306_v16 }
 0x23e   : > { %v2466_v19 = vpop.eup %2465  ;;  %2477 = vpow2.f32 %v1179_v4 }
 0x23f   : > { %v2468_v36 = vpop.eup %2467  ;;  %2479 = vpow2.f32 %v1181_v7  ;;  %1544 = vmatmul.mubr.bf16.gmra.mrb[52].mxu1 %v1305_v8 }
 0x240   : > { %v2470_v39 = vpop.eup %2469  ;;  %v1267_v52 = vadd.f32 %v2468_v36, %v2466_v19 }
 0x241   : > { %v2472_v17 = vpop.eup %2471  ;;  %v1307_v15 = vpack.c.bf16 %v2470_v39, %v2466_v19 }
 0x242   : > { %1268 = vadd.xlane.f32.xlu0 %v1267_v52  ;;  %v1270_v55 = vadd.f32 %v2472_v17, %v2470_v39  ;;  %v1308_v11 = vpack.c.bf16 %v2472_v17, %v2468_v36 }
 0x244   : > { %1271 = vadd.xlane.f32.xlu1 %v1270_v55  ;;  %1551 = vmatprep.mubr.bf16.mxu1 %v1308_v11 }
 0x246   : > { %v2474_v57 = vpop.eup %2473 }
 0x247   : > { %v2476_v61 = vpop.eup %2475  ;;  %1552 = vmatmul.mubr.bf16.gmra.mrb[56].mxu1 %v1307_v15 }
 0x248   : > { %v2478_v1 = vpop.eup %2477  ;;  %v1273_v31 = vadd.f32 %v2476_v61, %v2474_v57 }
 0x249   : > { %v2480_v9 = vpop.eup %2479  ;;  %v1309_v0 = vpack.c.bf16 %v2478_v1, %v2474_v57 }
 0x24a   : > { %1274 = vadd.xlane.f32.xlu0 %v1273_v31  ;;  %v1276_v42 = vadd.f32 %v2480_v9, %v2478_v1  ;;  %v1310_v44 = vpack.c.bf16 %v2480_v9, %v2476_v61 }
 0x24c   : > { %1277 = vadd.xlane.f32.xlu1 %v1276_v42  ;;  %1559 = vmatprep.mubr.bf16.mxu1 %v1310_v44 }
 0x24f   : > { %1560 = vmatmul.mubr.bf16.gmra.mrb[60].mxu1 %v1309_v0 }
 0x25f   : > { %v1185_v45 = vpop.xlane.xlu0 %1184 }
 0x260   : > { %2481 = vrcp.f32 %v1185_v45 }
 0x264   : > { %v1188_v2 = vpop.xlane.xlu1 %1187 }
 0x265   : > { %2483 = vrcp.f32 %v1188_v2 }
 0x267   : > { %v1191_v32 = vpop.xlane.xlu0 %1190 }
 0x268   : > { %2485 = vrcp.f32 %v1191_v32 }
 0x26a   : > { %v2482_v23 = vpop.eup %2481 }
 0x26c   : > { %v1194_v3 = vpop.xlane.xlu1 %1193 }
 0x26d   : > { %2487 = vrcp.f32 %v1194_v3 }
 0x26f   : > { %v2484_v27 = vpop.eup %2483  ;;  %v1197_v22 = vpop.xlane.xlu0 %1196 }
 0x270   : > { %2489 = vrcp.f32 %v1197_v22 }
 0x272   : > { %v1200_v5 = vpop.xlane.xlu1 %1199  ;;  %v2486_v30 = vpop.eup %2485 }
 0x273   : > { %2491 = vrcp.f32 %v1200_v5 }
 0x277   : > { %v2488_v59 = vpop.eup %2487  ;;  %v1203_v62 = vpop.xlane.xlu0 %1202 }
 0x278   : > { %2493 = vrcp.f32 %v1203_v62 }
 0x27a   : > { %v1206_v49 = vpop.xlane.xlu1 %1205  ;;  %v2490_v47 = vpop.eup %2489 }
 0x27b   : > { %2495 = vrcp.f32 %v1206_v49 }
 0x27d   : > { %v2492_v12 = vpop.eup %2491 }
 0x27f   : > { %v1209_v63 = vpop.xlane.xlu0 %1208 }
 0x280   : > { %2497 = vrcp.f32 %v1209_v63 }
 0x282   : > { %v1212_v16 = vpop.xlane.xlu1 %1211  ;;  %v2494_v39 = vpop.eup %2493 }
 0x283   : > { %2499 = vrcp.f32 %v1212_v16 }
 0x285   : > { %v2496_v11 = vpop.eup %2495 }
 0x287   : > { %v1215_v15 = vpop.xlane.xlu0 %1214 }
 0x288   : > { %2501 = vrcp.f32 %v1215_v15 }
 0x28a   : > { %v1218_v1 = vpop.xlane.xlu1 %1217  ;;  %v2498_v45 = vpop.eup %2497 }
 0x28b   : > { %2503 = vrcp.f32 %v1218_v1 }
 0x2aa   : > { %v2161_v24 = vpop.f32.mrb[0].mxu1 }
 0x2ab   : > { %v2162_v20 = vpop.f32.mrb[1].mxu1 }
 0x2ac   : > { %v2163_v13 = vadd.f32 %v2162_v20, %v2161_v24  ;;  %v2164_v18 = vpop.f32.mrb[2].mxu1  ;;  %v2500_v24 = vpop.eup %2499 }
 0x2ad   : > { %v2165_v46 = vpop.f32.mrb[3].mxu1  ;;  %v1221_v20 = vpop.xlane.xlu0 %1220 }
 0x2ae   : > { %v1600_v50 = vmul.f32 %v2482_v23, %v2163_v13  ;;  %v2166_v21 = vadd.f32 %v2165_v46, %v2164_v18  ;;  %v1224_v23 = vpop.xlane.xlu1 %1223  ;;  %2505 = vrcp.f32 %v1221_v20 }
 0x2af   : > { %2507 = vrcp.f32 %v1224_v23 }
 0x2b0   : > { %v2065_v26 = vpack.c.bf16 %v1600_v50, %v1600_v50  ;;  %v1601_v29 = vmul.f32 %v2484_v27, %v2166_v21 }
 0x2b2   : > { %1761 = vst.msk [vmem:[%s3087_s13] sm:$0xf] %vm1760_vm1, %v2065_v26  ;;  %v2066_v25 = vpack.c.bf16 %v1601_v29, %v1601_v29  ;;  %v2167_v54 = vpop.f32.mrb[4].mxu1  ;;  %v2502_v26 = vpop.eup %2501 }
 0x2b3   : > { %v2168_v58 = vpop.f32.mrb[5].mxu1 }
 0x2b4   : > { %1762 = vst.msk [vmem:[%s3087_s13 + $0x4] sm:$0xf] %vm1760_vm1, %v2066_v25  ;;  %v2169_v6 = vadd.f32 %v2168_v58, %v2167_v54  ;;  %v2170_v28 = vpop.f32.mrb[6].mxu1  ;;  %v2504_v54 = vpop.eup %2503 }
 0x2b5   : > { %v2171_v60 = vpop.f32.mrb[7].mxu1  ;;  %v1227_v58 = vpop.xlane.xlu0 %1226 }
 0x2b6   : > { %v1602_v35 = vmul.f32 %v2486_v30, %v2169_v6  ;;  %v2172_v41 = vadd.f32 %v2171_v60, %v2170_v28  ;;  %v1230_v30 = vpop.xlane.xlu1 %1229  ;;  %2509 = vrcp.f32 %v1227_v58 }
 0x2b7   : > { %2511 = vrcp.f32 %v1230_v30 }
 0x2b8   : > { %v2067_v33 = vpack.c.bf16 %v1602_v35, %v1602_v35  ;;  %v1603_v38 = vmul.f32 %v2488_v59, %v2172_v41 }
 0x2ba   : > { %1763 = vst.msk [vmem:[%s3087_s13 + $0x8] sm:$0xf] %vm1760_vm1, %v2067_v33  ;;  %v2068_v53 = vpack.c.bf16 %v1603_v38, %v1603_v38  ;;  %v2173_v34 = vpop.f32.mrb[8].mxu1  ;;  %v2506_v33 = vpop.eup %2505 }
 0x2bb   : > { %v2174_v37 = vpop.f32.mrb[9].mxu1 }
 0x2bc   : > { %1764 = vst.msk [vmem:[%s3087_s13 + $0xc] sm:$0xf] %vm1760_vm1, %v2068_v53  ;;  %v2175_v48 = vadd.f32 %v2174_v37, %v2173_v34  ;;  %v2176_v51 = vpop.f32.mrb[10].mxu1  ;;  %v2508_v34 = vpop.eup %2507 }
 0x2bd   : > { %v2177_v40 = vpop.f32.mrb[11].mxu1  ;;  %v1233_v37 = vpop.xlane.xlu0 %1232 }
 0x2be   : > { %v1604_v43 = vmul.f32 %v2490_v47, %v2175_v48  ;;  %v2178_v10 = vadd.f32 %v2177_v40, %v2176_v51  ;;  %v1236_v47 = vpop.xlane.xlu1 %1235  ;;  %2513 = vrcp.f32 %v1233_v37 }
 0x2bf   : > { %2515 = vrcp.f32 %v1236_v47 }
 0x2c0   : > { %v2069_v56 = vpack.c.bf16 %v1604_v43, %v1604_v43  ;;  %v1605_v14 = vmul.f32 %v2492_v12, %v2178_v10 }
 0x2c2   : > { %1765 = vst.msk [vmem:[%s3087_s13 + $0x10] sm:$0xf] %vm1760_vm1, %v2069_v56  ;;  %v2070_v4 = vpack.c.bf16 %v1605_v14, %v1605_v14  ;;  %v2179_v7 = vpop.f32.mrb[12].mxu1  ;;  %v2510_v56 = vpop.eup %2509 }
 0x2c3   : > { %v2180_v8 = vpop.f32.mrb[13].mxu1 }
 0x2c4   : > { %1766 = vst.msk [vmem:[%s3087_s13 + $0x14] sm:$0xf] %vm1760_vm1, %v2070_v4  ;;  %v2181_v19 = vadd.f32 %v2180_v8, %v2179_v7  ;;  %v2182_v36 = vpop.f32.mrb[14].mxu1  ;;  %v2512_v7 = vpop.eup %2511 }
 0x2c5   : > { %v2183_v52 = vpop.f32.mrb[15].mxu1  ;;  %v1239_v8 = vpop.xlane.xlu0 %1238 }
 0x2c6   : > { %v1606_v17 = vmul.f32 %v2494_v39, %v2181_v19  ;;  %v2184_v55 = vadd.f32 %v2183_v52, %v2182_v36  ;;  %v1242_v39 = vpop.xlane.xlu1 %1241  ;;  %2517 = vrcp.f32 %v1239_v8 }
 0x2c7   : > { %2519 = vrcp.f32 %v1242_v39 }
 0x2c8   : > { %v2071_v57 = vpack.c.bf16 %v1606_v17, %v1606_v17  ;;  %v1607_v61 = vmul.f32 %v2496_v11, %v2184_v55 }
 0x2ca   : > { %1767 = vst.msk [vmem:[%s3087_s13 + $0x18] sm:$0xf] %vm1760_vm1, %v2071_v57  ;;  %v2072_v31 = vpack.c.bf16 %v1607_v61, %v1607_v61  ;;  %v2185_v9 = vpop.f32.mrb[16].mxu1  ;;  %v2514_v57 = vpop.eup %2513 }
 0x2cb   : > { %v2186_v42 = vpop.f32.mrb[17].mxu1 }
 0x2cc   : > { %1768 = vst.msk [vmem:[%s3087_s13 + $0x1c] sm:$0xf] %vm1760_vm1, %v2072_v31  ;;  %v2187_v44 = vadd.f32 %v2186_v42, %v2185_v9  ;;  %v2188_v0 = vpop.f32.mrb[18].mxu1  ;;  %v2516_v9 = vpop.eup %2515 }
 0x2cd   : > { %v2189_v2 = vpop.f32.mrb[19].mxu1  ;;  %v1245_v42 = vpop.xlane.xlu0 %1244 }
 0x2ce   : > { %v1608_v32 = vmul.f32 %v2498_v45, %v2187_v44  ;;  %v2190_v3 = vadd.f32 %v2189_v2, %v2188_v0  ;;  %v1248_v45 = vpop.xlane.xlu1 %1247  ;;  %2521 = vrcp.f32 %v1245_v42 }
 0x2cf   : > { %2523 = vrcp.f32 %v1248_v45 }
 0x2d0   : > { %v2073_v13 = vpack.c.bf16 %v1608_v32, %v1608_v32  ;;  %v1609_v18 = vmul.f32 %v2500_v24, %v2190_v3 }
 0x2d2   : > { %1769 = vst.msk [vmem:[%s3087_s13 + $0x20] sm:$0xf] %vm1760_vm1, %v2073_v13  ;;  %v2074_v46 = vpack.c.bf16 %v1609_v18, %v1609_v18  ;;  %v2191_v50 = vpop.f32.mrb[20].mxu1  ;;  %v2518_v13 = vpop.eup %2517 }
 0x2d3   : > { %v2192_v21 = vpop.f32.mrb[21].mxu1 }
 0x2d4   : > { %1770 = vst.msk [vmem:[%s3087_s13 + $0x24] sm:$0xf] %vm1760_vm1, %v2074_v46  ;;  %v2193_v27 = vadd.f32 %v2192_v21, %v2191_v50  ;;  %v2194_v22 = vpop.f32.mrb[22].mxu1  ;;  %v2520_v50 = vpop.eup %2519 }
 0x2d5   : > { %v2195_v29 = vpop.f32.mrb[23].mxu1  ;;  %v1251_v21 = vpop.xlane.xlu0 %1250 }
 0x2d6   : > { %v1610_v5 = vmul.f32 %v2502_v26, %v2193_v27  ;;  %v2196_v25 = vadd.f32 %v2195_v29, %v2194_v22  ;;  %v1254_v26 = vpop.xlane.xlu1 %1253  ;;  %2525 = vrcp.f32 %v1251_v21 }
 0x2d7   : > { %2527 = vrcp.f32 %v1254_v26 }
 0x2d8   : > { %v2075_v6 = vpack.c.bf16 %v1610_v5, %v1610_v5  ;;  %v1611_v28 = vmul.f32 %v2504_v54, %v2196_v25 }
 0x2da   : > { %1771 = vst.msk [vmem:[%s3087_s13 + $0x28] sm:$0xf] %vm1760_vm1, %v2075_v6  ;;  %v2076_v60 = vpack.c.bf16 %v1611_v28, %v1611_v28  ;;  %v2197_v35 = vpop.f32.mrb[24].mxu1  ;;  %v2522_v6 = vpop.eup %2521 }
 0x2db   : > { %v2198_v41 = vpop.f32.mrb[25].mxu1 }
 0x2dc   : > { %1772 = vst.msk [vmem:[%s3087_s13 + $0x2c] sm:$0xf] %vm1760_vm1, %v2076_v60  ;;  %v2199_v59 = vadd.f32 %v2198_v41, %v2197_v35  ;;  %v2200_v62 = vpop.f32.mrb[26].mxu1  ;;  %v2524_v35 = vpop.eup %2523 }
 0x2dd   : > { %v2201_v38 = vpop.f32.mrb[27].mxu1  ;;  %v1257_v41 = vpop.xlane.xlu0 %1256 }
 0x2de   : > { %v1612_v49 = vmul.f32 %v2506_v33, %v2199_v59  ;;  %v2202_v53 = vadd.f32 %v2201_v38, %v2200_v62  ;;  %v1260_v33 = vpop.xlane.xlu1 %1259  ;;  %2529 = vrcp.f32 %v1257_v41 }
 0x2df   : > { %2531 = vrcp.f32 %v1260_v33 }
 0x2e0   : > { %v2077_v48 = vpack.c.bf16 %v1612_v49, %v1612_v49  ;;  %v1613_v51 = vmul.f32 %v2508_v34, %v2202_v53 }
 0x2e2   : > { %1773 = vst.msk [vmem:[%s3087_s13 + $0x30] sm:$0xf] %vm1760_vm1, %v2077_v48  ;;  %v2078_v40 = vpack.c.bf16 %v1613_v51, %v1613_v51  ;;  %v2203_v43 = vpop.f32.mrb[28].mxu1  ;;  %v2526_v48 = vpop.eup %2525 }
 0x2e3   : > { %v2204_v10 = vpop.f32.mrb[29].mxu1 }
 0x2e4   : > { %1774 = vst.msk [vmem:[%s3087_s13 + $0x34] sm:$0xf] %vm1760_vm1, %v2078_v40  ;;  %v2205_v12 = vadd.f32 %v2204_v10, %v2203_v43  ;;  %v2206_v63 = vpop.f32.mrb[30].mxu1  ;;  %v2528_v43 = vpop.eup %2527 }
 0x2e5   : > { %v2207_v14 = vpop.f32.mrb[31].mxu1  ;;  %v1263_v10 = vpop.xlane.xlu0 %1262 }
 0x2e6   : > { %v1614_v16 = vmul.f32 %v2510_v56, %v2205_v12  ;;  %v2208_v4 = vadd.f32 %v2207_v14, %v2206_v63  ;;  %v1266_v56 = vpop.xlane.xlu1 %1265  ;;  %2533 = vrcp.f32 %v1263_v10 }
 0x2e7   : > { %2535 = vrcp.f32 %v1266_v56 }
 0x2e8   : > { %v2079_v19 = vpack.c.bf16 %v1614_v16, %v1614_v16  ;;  %v1615_v36 = vmul.f32 %v2512_v7, %v2208_v4 }
 0x2ea   : > { %1775 = vst.msk [vmem:[%s3087_s13 + $0x38] sm:$0xf] %vm1760_vm1, %v2079_v19  ;;  %v2080_v52 = vpack.c.bf16 %v1615_v36, %v1615_v36  ;;  %v2209_v17 = vpop.f32.mrb[32].mxu1  ;;  %v2530_v19 = vpop.eup %2529 }
 0x2eb   : > { %v2210_v55 = vpop.f32.mrb[33].mxu1 }
 0x2ec   : > { %1776 = vst.msk [vmem:[%s3087_s13 + $0x3c] sm:$0xf] %vm1760_vm1, %v2080_v52  ;;  %v2211_v11 = vadd.f32 %v2210_v55, %v2209_v17  ;;  %v2212_v15 = vpop.f32.mrb[34].mxu1  ;;  %v2532_v17 = vpop.eup %2531 }
 0x2ed   : > { %v2213_v61 = vpop.f32.mrb[35].mxu1  ;;  %v1269_v55 = vpop.xlane.xlu0 %1268 }
 0x2ee   : > { %v1616_v1 = vmul.f32 %v2514_v57, %v2211_v11  ;;  %v2214_v31 = vadd.f32 %v2213_v61, %v2212_v15  ;;  %v1272_v57 = vpop.xlane.xlu1 %1271  ;;  %2537 = vrcp.f32 %v1269_v55 }
 0x2ef   : > { %2539 = vrcp.f32 %v1272_v57 }
 0x2f0   : > { %v2081_v44 = vpack.c.bf16 %v1616_v1, %v1616_v1  ;;  %v1617_v0 = vmul.f32 %v2516_v9, %v2214_v31 }
 0x2f2   : > { %1777 = vst.msk [vmem:[%s3087_s13 + $0x40] sm:$0xf] %vm1760_vm1, %v2081_v44  ;;  %v2082_v2 = vpack.c.bf16 %v1617_v0, %v1617_v0  ;;  %v2215_v32 = vpop.f32.mrb[36].mxu1  ;;  %v2534_v44 = vpop.eup %2533 }
 0x2f3   : > { %v2216_v3 = vpop.f32.mrb[37].mxu1 }
 0x2f4   : > { %1778 = vst.msk [vmem:[%s3087_s13 + $0x44] sm:$0xf] %vm1760_vm1, %v2082_v2  ;;  %v2217_v24 = vadd.f32 %v2216_v3, %v2215_v32  ;;  %v2218_v20 = vpop.f32.mrb[38].mxu1  ;;  %v2536_v32 = vpop.eup %2535 }
 0x2f5   : > { %v2219_v18 = vpop.f32.mrb[39].mxu1  ;;  %v1275_v3 = vpop.xlane.xlu0 %1274 }
 0x2f6   : > { %v1618_v23 = vmul.f32 %v2518_v13, %v2217_v24  ;;  %v2220_v46 = vadd.f32 %v2219_v18, %v2218_v20  ;;  %v1278_v13 = vpop.xlane.xlu1 %1277  ;;  %2541 = vrcp.f32 %v1275_v3 }
 0x2f7   : > { %2543 = vrcp.f32 %v1278_v13 }
 0x2f8   : > { %v2083_v27 = vpack.c.bf16 %v1618_v23, %v1618_v23  ;;  %v1619_v22 = vmul.f32 %v2520_v50, %v2220_v46 }
 0x2fa   : > { %1779 = vst.msk [vmem:[%s3087_s13 + $0x48] sm:$0xf] %vm1760_vm1, %v2083_v27  ;;  %v2084_v29 = vpack.c.bf16 %v1619_v22, %v1619_v22  ;;  %v2221_v5 = vpop.f32.mrb[40].mxu1  ;;  %v2538_v27 = vpop.eup %2537 }
 0x2fb   : > { %v2222_v25 = vpop.f32.mrb[41].mxu1 }
 0x2fc   : > { %1780 = vst.msk [vmem:[%s3087_s13 + $0x4c] sm:$0xf] %vm1760_vm1, %v2084_v29  ;;  %v2223_v54 = vadd.f32 %v2222_v25, %v2221_v5  ;;  %v2224_v58 = vpop.f32.mrb[42].mxu1  ;;  %v2540_v5 = vpop.eup %2539 }
 0x2fd   : > { %v2225_v28 = vpop.f32.mrb[43].mxu1 }
 0x2fe   : > { %v1620_v30 = vmul.f32 %v2522_v6, %v2223_v54  ;;  %v2226_v60 = vadd.f32 %v2225_v28, %v2224_v58 }
 0x300   : > { %v2085_v59 = vpack.c.bf16 %v1620_v30, %v1620_v30  ;;  %v1621_v62 = vmul.f32 %v2524_v35, %v2226_v60  ;;  %v2542_v35 = vpop.eup %2541 }
 0x301   : > { %v2544_v33 = vpop.eup %2543 }
 0x302   : > { %1781 = vst.msk [vmem:[%s3087_s13 + $0x50] sm:$0xf] %vm1760_vm1, %v2085_v59  ;;  %v2086_v38 = vpack.c.bf16 %v1621_v62, %v1621_v62  ;;  %v2227_v49 = vpop.f32.mrb[44].mxu1 }
 0x303   : > { %v2228_v53 = vpop.f32.mrb[45].mxu1 }
 0x304   : > { %1782 = vst.msk [vmem:[%s3087_s13 + $0x54] sm:$0xf] %vm1760_vm1, %v2086_v38  ;;  %v2229_v34 = vadd.f32 %v2228_v53, %v2227_v49  ;;  %v2230_v37 = vpop.f32.mrb[46].mxu1 }
 0x305   : > { %v2231_v51 = vpop.f32.mrb[47].mxu1 }
 0x306   : > { %v1622_v47 = vmul.f32 %v2526_v48, %v2229_v34  ;;  %v2232_v40 = vadd.f32 %v2231_v51, %v2230_v37 }
 0x308   : > { %v2087_v12 = vpack.c.bf16 %v1622_v47, %v1622_v47  ;;  %v1623_v63 = vmul.f32 %v2528_v43, %v2232_v40 }
 0x30a   : > { %1783 = vst.msk [vmem:[%s3087_s13 + $0x58] sm:$0xf] %vm1760_vm1, %v2087_v12  ;;  %v2088_v14 = vpack.c.bf16 %v1623_v63, %v1623_v63  ;;  %v2233_v16 = vpop.f32.mrb[48].mxu1 }
 0x30b   : > { %v2234_v4 = vpop.f32.mrb[49].mxu1 }
 0x30c   : > { %1784 = vst.msk [vmem:[%s3087_s13 + $0x5c] sm:$0xf] %vm1760_vm1, %v2088_v14  ;;  %v2235_v7 = vadd.f32 %v2234_v4, %v2233_v16  ;;  %v2236_v8 = vpop.f32.mrb[50].mxu1 }
 0x30d   : > { %v2237_v36 = vpop.f32.mrb[51].mxu1 }
 0x30e   : > { %v1624_v39 = vmul.f32 %v2530_v19, %v2235_v7  ;;  %v2238_v52 = vadd.f32 %v2237_v36, %v2236_v8 }
 0x310   : > { %v2089_v11 = vpack.c.bf16 %v1624_v39, %v1624_v39  ;;  %v1625_v15 = vmul.f32 %v2532_v17, %v2238_v52 }
 0x312   : > { %1785 = vst.msk [vmem:[%s3087_s13 + $0x60] sm:$0xf] %vm1760_vm1, %v2089_v11  ;;  %v2090_v61 = vpack.c.bf16 %v1625_v15, %v1625_v15  ;;  %v2239_v1 = vpop.f32.mrb[52].mxu1 }
 0x313   : > { %v2240_v31 = vpop.f32.mrb[53].mxu1 }
 0x314   : > { %1786 = vst.msk [vmem:[%s3087_s13 + $0x64] sm:$0xf] %vm1760_vm1, %v2090_v61  ;;  %v2241_v9 = vadd.f32 %v2240_v31, %v2239_v1  ;;  %v2242_v42 = vpop.f32.mrb[54].mxu1 }
 0x315   : > { %v2243_v0 = vpop.f32.mrb[55].mxu1 }
 0x316   : > { %v1626_v45 = vmul.f32 %v2534_v44, %v2241_v9  ;;  %v2244_v2 = vadd.f32 %v2243_v0, %v2242_v42 }
 0x318   : > { %v2091_v24 = vpack.c.bf16 %v1626_v45, %v1626_v45  ;;  %v1627_v20 = vmul.f32 %v2536_v32, %v2244_v2 }
 0x31a   : > { %1787 = vst.msk [vmem:[%s3087_s13 + $0x68] sm:$0xf] %vm1760_vm1, %v2091_v24  ;;  %v2092_v18 = vpack.c.bf16 %v1627_v20, %v1627_v20  ;;  %v2245_v23 = vpop.f32.mrb[56].mxu1 }
 0x31b   : > { %v2246_v46 = vpop.f32.mrb[57].mxu1 }
 0x31c   : > { %1788 = vst.msk [vmem:[%s3087_s13 + $0x6c] sm:$0xf] %vm1760_vm1, %v2092_v18  ;;  %v2247_v50 = vadd.f32 %v2246_v46, %v2245_v23  ;;  %v2248_v21 = vpop.f32.mrb[58].mxu1 }
 0x31d   : > { %v2249_v22 = vpop.f32.mrb[59].mxu1 }
 0x31e   : > { %v1628_v26 = vmul.f32 %v2538_v27, %v2247_v50  ;;  %v2250_v29 = vadd.f32 %v2249_v22, %v2248_v21 }
 0x320   : > { %v2093_v25 = vpack.c.bf16 %v1628_v26, %v1628_v26  ;;  %v1629_v54 = vmul.f32 %v2540_v5, %v2250_v29 }
 0x322   : > { %1789 = vst.msk [vmem:[%s3087_s13 + $0x70] sm:$0xf] %vm1760_vm1, %v2093_v25  ;;  %v2094_v58 = vpack.c.bf16 %v1629_v54, %v1629_v54  ;;  %v2251_v6 = vpop.f32.mrb[60].mxu1 }
 0x323   : > { %v2252_v28 = vpop.f32.mrb[61].mxu1 }
 0x324   : > { %1790 = vst.msk [vmem:[%s3087_s13 + $0x74] sm:$0xf] %vm1760_vm1, %v2094_v58  ;;  %v2253_v30 = vadd.f32 %v2252_v28, %v2251_v6  ;;  %v2254_v60 = vpop.f32.mrb[62].mxu1 }
 0x325   : > { %v2255_v41 = vpop.f32.mrb[63].mxu1 }
 0x326   : > { %v1630_v59 = vmul.f32 %v2542_v35, %v2253_v30  ;;  %v2256_v62 = vadd.f32 %v2255_v41, %v2254_v60 }
 0x328   : > { %v2095_v38 = vpack.c.bf16 %v1630_v59, %v1630_v59  ;;  %v1631_v49 = vmul.f32 %v2544_v33, %v2256_v62 }
 0x32a   : > { %1791 = vst.msk [vmem:[%s3087_s13 + $0x78] sm:$0xf] %vm1760_vm1, %v2095_v38  ;;  %v2096_v53 = vpack.c.bf16 %v1631_v49, %v1631_v49 }
 0x32c   : > { %1792 = vst.msk [vmem:[%s3087_s13 + $0x7c] sm:$0xf] %vm1760_vm1, %v2096_v53 }
 0x32d PF: > { %s14_s19 = sadd.s32 1, %s2583_s19   ;;  %s3212_s15 = smov %s2575_s17 }
 0x32e   : > { %p11_p7 = scmp.ge.s32.totalorder %s14_s19, 10   ;;  %s3213_s16 = smov %s2579_s18 }
 0x32f   : > { %s3214_s17 = smov %s3217_s20  ;;  %s3215_s18 = smov %s3221_s21 }
 0x330   :  { %13 = sbr.rel (!%p11_p7) target bundleno = 3 (0x3), region = 72 }

</bundles_post_ra>
